<compile_context>
chip_gen: v7x
topology: tpu7x:2x2x1
jax: 0.10.0
libtpu: 0.0.40
codegen_flags: <defaults>
</compile_context>

<pallas_src>
import functools

import jax
import jax.numpy as jnp
from jax.experimental import pallas as pl
from jax.experimental.pallas import tpu as pltpu


def _sppf_kernel(W, pad, x_ref, w1_ref, b1_ref, w2_ref, b2_ref, pos_ref,
                 o_ref):
    Mp = x_ref.shape[-1]                      # lane-padded spatial length
    f32 = jnp.float32
    bf16 = jnp.bfloat16
    NEG = f32(-1e30)

    def silu(t):
        # x * sigmoid(x); exp and the approximate reciprocal both run on EUP.
        return t * pl.reciprocal(1.0 + jnp.exp(-t), approx=True)

    pos = pos_ref[...]                        # (2, Mp): row ids, col ids
    hpos = pos[0:1, :]
    cpos = pos[1:2, :]

    # Additive -1e30 biases marking out-of-window / padded neighbours for
    # every (offset, rotation) used by the separable pooling.  Rolling the
    # tiny (1, Mp) index rows with the SAME shifts as the data makes the masks
    # independent of the rotation-direction convention; checking both row and
    # column indices makes wrap-around through the lane padding safe.
    row_terms = []    # horizontal (within-row) window offsets
    col_terms = []    # vertical   (across-row) window offsets
    for s in range(1, pad + 1):
        fs = f32(s)
        for shift in (s, Mp - s):
            hr = pltpu.roll(hpos, shift, axis=1)
            cr = pltpu.roll(cpos, shift, axis=1)
            ok = (hr == hpos) & (jnp.abs(cr - cpos) == fs)
            row_terms.append((shift, jnp.where(ok, f32(0.0), NEG)))
        for shift in (s * W, Mp - s * W):
            hr = pltpu.roll(hpos, shift, axis=1)
            cr = pltpu.roll(cpos, shift, axis=1)
            ok = (jnp.abs(hr - hpos) == fs) & (cr == cpos)
            col_terms.append((shift, jnp.where(ok, f32(0.0), NEG)))

    def maxpool(a):                           # k x k, stride 1, pad k//2
        r = a                                 # 1-D max along W
        for shift, bias in row_terms:
            r = jnp.maximum(r, pltpu.roll(a, shift, axis=1) + bias)
        out = r                               # 1-D max along H
        for shift, bias in col_terms:
            out = jnp.maximum(out, pltpu.roll(r, shift, axis=1) + bias)
        return out

    # cv1: 1x1 conv (+ folded BN) + SiLU as bf16 (c_, c1) @ (c1, Mp) on the
    # MXU with f32 accumulation.
    a = silu(jnp.dot(w1_ref[...], x_ref[...],
                     preferred_element_type=jnp.float32) + b1_ref[...])
    y1 = maxpool(a)
    y2 = maxpool(y1)
    y3 = maxpool(y2)

    # cv2 on cat([a, y1, y2, y3], channel): four bf16 partial matmuls, no
    # in-kernel concatenate.
    t = (jnp.dot(w2_ref[0], a.astype(bf16), preferred_element_type=jnp.float32)
         + jnp.dot(w2_ref[1], y1.astype(bf16), preferred_element_type=jnp.float32)
         + jnp.dot(w2_ref[2], y2.astype(bf16), preferred_element_type=jnp.float32)
         + jnp.dot(w2_ref[3], y3.astype(bf16), preferred_element_type=jnp.float32)
         + b2_ref[...])
    o_ref[...] = silu(t)


@functools.partial(jax.jit, static_argnames=("k",))
def _sppf_pallas_forward(x, w1, b1, w2, b2, k):
    bs, c1, H, W = x.shape
    pad = k // 2
    assert H > 2 * pad, "SPPF Pallas kernel requires H > 2*(k//2)"
    M = H * W
    Mp = ((M + 127) // 128) * 128             # lane-dense spatial length
    c_ = w1.shape[0]
    c2 = w2.shape[1]

    x3 = x.reshape(bs, c1, M).astype(jnp.bfloat16)      # free reshape + bf16
    if Mp != M:
        x3 = jnp.pad(x3, ((0, 0), (0, 0), (0, Mp - M)))

    # Row / column index of every lane; padded lanes get a far-away sentinel
    # so every pooling mask rejects them.
    rows = jnp.repeat(jnp.arange(H, dtype=jnp.float32), W)
    cols = jnp.tile(jnp.arange(W, dtype=jnp.float32), H)
    sent = jnp.full((Mp - M,), -1e6, dtype=jnp.float32)
    pos = jnp.stack([jnp.concatenate([rows, sent]),
                     jnp.concatenate([cols, sent])], axis=0)       # (2, Mp)

    kernel = functools.partial(_sppf_kernel, W, pad)
    out = pl.pallas_call(
        kernel,
        out_shape=jax.ShapeDtypeStruct((bs, c2, Mp), jnp.float32),
        grid_spec=pltpu.PrefetchScalarGridSpec(
            num_scalar_prefetch=0,
            grid=(bs,),
            in_specs=[
                pl.BlockSpec((None, c1, Mp), lambda b: (b, 0, 0)),  # x slab
                pl.BlockSpec((c_, c1), lambda b: (0, 0)),           # cv1 w
                pl.BlockSpec((c_, 1), lambda b: (0, 0)),            # cv1 b
                pl.BlockSpec((4, c2, c_), lambda b: (0, 0, 0)),     # cv2 w
                pl.BlockSpec((c2, 1), lambda b: (0, 0)),            # cv2 b
                pl.BlockSpec((2, Mp), lambda b: (0, 0)),            # row/col
            ],
            out_specs=pl.BlockSpec((None, c2, Mp), lambda b: (b, 0, 0)),
        ),
        compiler_params=pltpu.CompilerParams(
            dimension_semantics=("parallel",)),
    )(x3, w1, b1, w2, b2, pos)
    return out[:, :, :M].reshape(bs, c2, H, W)


class SPPFPallas:
    """JAX/Pallas port of YOLOv5-Lite SPPF (eval-mode forward, BN folded)."""

    def __init__(self, c1, c2, k, key):
        c_ = c1 // 2
        self.k = k
        self.eps = 1e-5                      # nn.BatchNorm2d default
        ks = jax.random.split(key, 10)
        # cv1 = Conv2d(c1, c_, 1, bias=False) + BatchNorm2d(c_) + SiLU
        self.w1_raw = jax.random.normal(ks[0], (c_, c1), jnp.float32) * 0.1
        self.g1 = 1.0 + 0.1 * jax.random.normal(ks[1], (c_,), jnp.float32)
        self.beta1 = 0.1 * jax.random.normal(ks[2], (c_,), jnp.float32)
        self.mu1 = 0.1 * jax.random.normal(ks[3], (c_,), jnp.float32)
        self.var1 = jax.random.uniform(ks[4], (c_,), jnp.float32, 0.5, 1.5)
        # cv2 = Conv2d(4*c_, c2, 1, bias=False) + BatchNorm2d(c2) + SiLU
        self.w2_raw = jax.random.normal(ks[5], (c2, 4 * c_), jnp.float32) * 0.1
        self.g2 = 1.0 + 0.1 * jax.random.normal(ks[6], (c2,), jnp.float32)
        self.beta2 = 0.1 * jax.random.normal(ks[7], (c2,), jnp.float32)
        self.mu2 = 0.1 * jax.random.normal(ks[8], (c2,), jnp.float32)
        self.var2 = jax.random.uniform(ks[9], (c2,), jnp.float32, 0.5, 1.5)

        # Fold BN into the 1x1 convs (inference path); cast weights to bf16
        # for full-rate MXU matmuls (biases stay f32 for the accumulation).
        s1 = self.g1 / jnp.sqrt(self.var1 + self.eps)
        self.w1 = (self.w1_raw * s1[:, None]).astype(jnp.bfloat16)   # (c_, c1)
        self.b1 = (self.beta1 - self.mu1 * s1)[:, None]              # (c_, 1)
        s2 = self.g2 / jnp.sqrt(self.var2 + self.eps)
        w2f = self.w2_raw * s2[:, None]                              # (c2, 4c_)
        self.w2 = jnp.stack(
            [w2f[:, j * c_:(j + 1) * c_] for j in range(4)],
            axis=0).astype(jnp.bfloat16)                             # (4,c2,c_)
        self.b2 = (self.beta2 - self.mu2 * s2)[:, None]              # (c2, 1)

    def __call__(self, x):
        return _sppf_pallas_forward(x, self.w1, self.b1, self.w2, self.b2,
                                    k=self.k)


def sppf_reference(m, x):
    """Pure-JAX/XLA f32 reference mirroring the PyTorch eval-mode forward."""
    def conv_bn_silu(v, w, g, beta, mu, var):
        t = jnp.einsum('oc,bchw->bohw', w, v)
        s = g / jnp.sqrt(var + m.eps)
        t = t * s[None, :, None, None] + (beta - mu * s)[None, :, None, None]
        return t * jax.nn.sigmoid(t)

    def maxpool(v):
        p = m.k // 2
        return jax.lax.reduce_window(
            v, -jnp.inf, jax.lax.max, (1, 1, m.k, m.k), (1, 1, 1, 1),
            [(0, 0), (0, 0), (p, p), (p, p)])

    a = conv_bn_silu(x, m.w1_raw, m.g1, m.beta1, m.mu1, m.var1)
    y1 = maxpool(a)
    y2 = maxpool(y1)
    y3 = maxpool(y2)
    cat = jnp.concatenate([a, y1, y2, y3], axis=1)
    return conv_bn_silu(cat, m.w2_raw, m.g2, m.beta2, m.mu2, m.var2)


if __name__ == "__main__":
    key = jax.random.PRNGKey(0)
    kx1, kx2, kp = jax.random.split(key, 3)

    c1, c2, k = 8, 16, 5          # c_ = 4
    mod = SPPFPallas(c1, c2, k, kp)

    # Tolerance covers the bf16 MXU matmuls and the approximate EUP
    # reciprocal in SiLU (f32 reference).
    TOL = 2e-2

    # Case 1: lane-aligned spatial size (16*16 = 256 is a multiple of 128).
    x1 = jax.random.normal(kx1, (2, c1, 16, 16), jnp.float32)
    out1 = jax.block_until_ready(mod(x1))
    assert out1.shape == (2, c2, 16, 16)
    ref1 = sppf_reference(mod, x1)
    assert jnp.allclose(out1, ref1, atol=TOL, rtol=TOL), \
        float(jnp.max(jnp.abs(out1 - ref1)))

    # Case 2: non-aligned spatial size (20*20 = 400 -> lane-padded to 512),
    # exercising the sentinel-masked lane padding.
    x2 = jax.random.normal(kx2, (1, c1, 20, 20), jnp.float32)
    out2 = jax.block_until_ready(mod(x2))
    assert out2.shape == (1, c2, 20, 20)
    ref2 = sppf_reference(mod, x2)
    assert jnp.allclose(out2, ref2, atol=TOL, rtol=TOL), \
        float(jnp.max(jnp.abs(out2 - ref2)))

    print("KERNEL_OK")
</pallas_src>

<mosaic_0001>
module attributes {stable_mosaic.version = 11 : i64} {
  func.func @_sppf_kernel(%arg0: i32, %arg1: memref<1x8x256xbf16, #tpu.memory_space<vmem>>, %arg2: memref<4x8xbf16, #tpu.memory_space<vmem>>, %arg3: memref<4x1xf32, #tpu.memory_space<vmem>>, %arg4: memref<4x16x4xbf16, #tpu.memory_space<vmem>>, %arg5: memref<16x1xf32, #tpu.memory_space<vmem>>, %arg6: memref<2x256xf32, #tpu.memory_space<vmem>>, %arg7: memref<1x16x256xf32, #tpu.memory_space<vmem>>) attributes {dimension_semantics = [#tpu.dimension_semantics<parallel>], iteration_bounds = array<i64: 2>, scalar_prefetch = 0 : i64, scratch_operands = 0 : i64, tpu.core_type = #tpu.core_type<tc>, window_params = [{transform_indices = @transform_0, window_bounds = array<i64: 1, 8, 256>}, {pipeline_mode = #tpu.pipeline_mode<synchronous>, transform_indices = @transform_1, window_bounds = array<i64: 4, 8>}, {pipeline_mode = #tpu.pipeline_mode<synchronous>, transform_indices = @transform_2, window_bounds = array<i64: 4, 1>}, {pipeline_mode = #tpu.pipeline_mode<synchronous>, transform_indices = @transform_3, window_bounds = array<i64: 4, 16, 4>}, {pipeline_mode = #tpu.pipeline_mode<synchronous>, transform_indices = @transform_4, window_bounds = array<i64: 16, 1>}, {pipeline_mode = #tpu.pipeline_mode<synchronous>, transform_indices = @transform_5, window_bounds = array<i64: 2, 256>}, {transform_indices = @transform_6, window_bounds = array<i64: 1, 16, 256>}]} {
    %c0 = arith.constant 0 : index
    %c0_0 = arith.constant 0 : index
    %0 = vector.load %arg6[%c0, %c0_0] : memref<2x256xf32, #tpu.memory_space<vmem>>, vector<2x256xf32>
    %1 = vector.extract_strided_slice %0 {offsets = [0, 0], sizes = [1, 256], strides = [1, 1]} : vector<2x256xf32> to vector<1x256xf32>
    %2 = vector.extract_strided_slice %0 {offsets = [1, 0], sizes = [1, 256], strides = [1, 1]} : vector<2x256xf32> to vector<1x256xf32>
    %c1_i32 = arith.constant 1 : i32
    %3 = tpu.dynamic_rotate %1 by %c1_i32 dim 1 : vector<1x256xf32>, i32 -> vector<1x256xf32>
    %c1_i32_1 = arith.constant 1 : i32
    %4 = tpu.dynamic_rotate %2 by %c1_i32_1 dim 1 : vector<1x256xf32>, i32 -> vector<1x256xf32>
    %5 = arith.cmpf oeq, %3, %1 : vector<1x256xf32>
    %6 = arith.subf %4, %2 : vector<1x256xf32>
    %7 = math.absf %6 : vector<1x256xf32>
    %cst = arith.constant 1.000000e+00 : f32
    %8 = vector.broadcast %cst : f32 to vector<1x256xf32>
    %9 = arith.cmpf oeq, %7, %8 : vector<1x256xf32>
    %10 = arith.andi %5, %9 : vector<1x256xi1>
    %cst_2 = arith.constant 0.000000e+00 : f32
    %cst_3 = arith.constant -1.000000e+30 : f32
    %11 = vector.broadcast %cst_2 : f32 to vector<1x256xf32>
    %12 = vector.broadcast %cst_3 : f32 to vector<1x256xf32>
    %13 = arith.select %10, %11, %12 : vector<1x256xi1>, vector<1x256xf32>
    %c255_i32 = arith.constant 255 : i32
    %14 = tpu.dynamic_rotate %1 by %c255_i32 dim 1 : vector<1x256xf32>, i32 -> vector<1x256xf32>
    %c255_i32_4 = arith.constant 255 : i32
    %15 = tpu.dynamic_rotate %2 by %c255_i32_4 dim 1 : vector<1x256xf32>, i32 -> vector<1x256xf32>
    %16 = arith.cmpf oeq, %14, %1 : vector<1x256xf32>
    %17 = arith.subf %15, %2 : vector<1x256xf32>
    %18 = math.absf %17 : vector<1x256xf32>
    %cst_5 = arith.constant 1.000000e+00 : f32
    %19 = vector.broadcast %cst_5 : f32 to vector<1x256xf32>
    %20 = arith.cmpf oeq, %18, %19 : vector<1x256xf32>
    %21 = arith.andi %16, %20 : vector<1x256xi1>
    %cst_6 = arith.constant 0.000000e+00 : f32
    %cst_7 = arith.constant -1.000000e+30 : f32
    %22 = vector.broadcast %cst_6 : f32 to vector<1x256xf32>
    %23 = vector.broadcast %cst_7 : f32 to vector<1x256xf32>
    %24 = arith.select %21, %22, %23 : vector<1x256xi1>, vector<1x256xf32>
    %c16_i32 = arith.constant 16 : i32
    %25 = tpu.dynamic_rotate %1 by %c16_i32 dim 1 : vector<1x256xf32>, i32 -> vector<1x256xf32>
    %c16_i32_8 = arith.constant 16 : i32
    %26 = tpu.dynamic_rotate %2 by %c16_i32_8 dim 1 : vector<1x256xf32>, i32 -> vector<1x256xf32>
    %27 = arith.subf %25, %1 : vector<1x256xf32>
    %28 = math.absf %27 : vector<1x256xf32>
    %cst_9 = arith.constant 1.000000e+00 : f32
    %29 = vector.broadcast %cst_9 : f32 to vector<1x256xf32>
    %30 = arith.cmpf oeq, %28, %29 : vector<1x256xf32>
    %31 = arith.cmpf oeq, %26, %2 : vector<1x256xf32>
    %32 = arith.andi %30, %31 : vector<1x256xi1>
    %cst_10 = arith.constant 0.000000e+00 : f32
    %cst_11 = arith.constant -1.000000e+30 : f32
    %33 = vector.broadcast %cst_10 : f32 to vector<1x256xf32>
    %34 = vector.broadcast %cst_11 : f32 to vector<1x256xf32>
    %35 = arith.select %32, %33, %34 : vector<1x256xi1>, vector<1x256xf32>
    %c240_i32 = arith.constant 240 : i32
    %36 = tpu.dynamic_rotate %1 by %c240_i32 dim 1 : vector<1x256xf32>, i32 -> vector<1x256xf32>
    %c240_i32_12 = arith.constant 240 : i32
    %37 = tpu.dynamic_rotate %2 by %c240_i32_12 dim 1 : vector<1x256xf32>, i32 -> vector<1x256xf32>
    %38 = arith.subf %36, %1 : vector<1x256xf32>
    %39 = math.absf %38 : vector<1x256xf32>
    %cst_13 = arith.constant 1.000000e+00 : f32
    %40 = vector.broadcast %cst_13 : f32 to vector<1x256xf32>
    %41 = arith.cmpf oeq, %39, %40 : vector<1x256xf32>
    %42 = arith.cmpf oeq, %37, %2 : vector<1x256xf32>
    %43 = arith.andi %41, %42 : vector<1x256xi1>
    %cst_14 = arith.constant 0.000000e+00 : f32
    %cst_15 = arith.constant -1.000000e+30 : f32
    %44 = vector.broadcast %cst_14 : f32 to vector<1x256xf32>
    %45 = vector.broadcast %cst_15 : f32 to vector<1x256xf32>
    %46 = arith.select %43, %44, %45 : vector<1x256xi1>, vector<1x256xf32>
    %c2_i32 = arith.constant 2 : i32
    %47 = tpu.dynamic_rotate %1 by %c2_i32 dim 1 : vector<1x256xf32>, i32 -> vector<1x256xf32>
    %c2_i32_16 = arith.constant 2 : i32
    %48 = tpu.dynamic_rotate %2 by %c2_i32_16 dim 1 : vector<1x256xf32>, i32 -> vector<1x256xf32>
    %49 = arith.cmpf oeq, %47, %1 : vector<1x256xf32>
    %50 = arith.subf %48, %2 : vector<1x256xf32>
    %51 = math.absf %50 : vector<1x256xf32>
    %cst_17 = arith.constant 2.000000e+00 : f32
    %52 = vector.broadcast %cst_17 : f32 to vector<1x256xf32>
    %53 = arith.cmpf oeq, %51, %52 : vector<1x256xf32>
    %54 = arith.andi %49, %53 : vector<1x256xi1>
    %cst_18 = arith.constant 0.000000e+00 : f32
    %cst_19 = arith.constant -1.000000e+30 : f32
    %55 = vector.broadcast %cst_18 : f32 to vector<1x256xf32>
    %56 = vector.broadcast %cst_19 : f32 to vector<1x256xf32>
    %57 = arith.select %54, %55, %56 : vector<1x256xi1>, vector<1x256xf32>
    %c254_i32 = arith.constant 254 : i32
    %58 = tpu.dynamic_rotate %1 by %c254_i32 dim 1 : vector<1x256xf32>, i32 -> vector<1x256xf32>
    %c254_i32_20 = arith.constant 254 : i32
    %59 = tpu.dynamic_rotate %2 by %c254_i32_20 dim 1 : vector<1x256xf32>, i32 -> vector<1x256xf32>
    %60 = arith.cmpf oeq, %58, %1 : vector<1x256xf32>
    %61 = arith.subf %59, %2 : vector<1x256xf32>
    %62 = math.absf %61 : vector<1x256xf32>
    %cst_21 = arith.constant 2.000000e+00 : f32
    %63 = vector.broadcast %cst_21 : f32 to vector<1x256xf32>
    %64 = arith.cmpf oeq, %62, %63 : vector<1x256xf32>
    %65 = arith.andi %60, %64 : vector<1x256xi1>
    %cst_22 = arith.constant 0.000000e+00 : f32
    %cst_23 = arith.constant -1.000000e+30 : f32
    %66 = vector.broadcast %cst_22 : f32 to vector<1x256xf32>
    %67 = vector.broadcast %cst_23 : f32 to vector<1x256xf32>
    %68 = arith.select %65, %66, %67 : vector<1x256xi1>, vector<1x256xf32>
    %c32_i32 = arith.constant 32 : i32
    %69 = tpu.dynamic_rotate %1 by %c32_i32 dim 1 : vector<1x256xf32>, i32 -> vector<1x256xf32>
    %c32_i32_24 = arith.constant 32 : i32
    %70 = tpu.dynamic_rotate %2 by %c32_i32_24 dim 1 : vector<1x256xf32>, i32 -> vector<1x256xf32>
    %71 = arith.subf %69, %1 : vector<1x256xf32>
    %72 = math.absf %71 : vector<1x256xf32>
    %cst_25 = arith.constant 2.000000e+00 : f32
    %73 = vector.broadcast %cst_25 : f32 to vector<1x256xf32>
    %74 = arith.cmpf oeq, %72, %73 : vector<1x256xf32>
    %75 = arith.cmpf oeq, %70, %2 : vector<1x256xf32>
    %76 = arith.andi %74, %75 : vector<1x256xi1>
    %cst_26 = arith.constant 0.000000e+00 : f32
    %cst_27 = arith.constant -1.000000e+30 : f32
    %77 = vector.broadcast %cst_26 : f32 to vector<1x256xf32>
    %78 = vector.broadcast %cst_27 : f32 to vector<1x256xf32>
    %79 = arith.select %76, %77, %78 : vector<1x256xi1>, vector<1x256xf32>
    %c224_i32 = arith.constant 224 : i32
    %80 = tpu.dynamic_rotate %1 by %c224_i32 dim 1 : vector<1x256xf32>, i32 -> vector<1x256xf32>
    %c224_i32_28 = arith.constant 224 : i32
    %81 = tpu.dynamic_rotate %2 by %c224_i32_28 dim 1 : vector<1x256xf32>, i32 -> vector<1x256xf32>
    %82 = arith.subf %80, %1 : vector<1x256xf32>
    %83 = math.absf %82 : vector<1x256xf32>
    %cst_29 = arith.constant 2.000000e+00 : f32
    %84 = vector.broadcast %cst_29 : f32 to vector<1x256xf32>
    %85 = arith.cmpf oeq, %83, %84 : vector<1x256xf32>
    %86 = arith.cmpf oeq, %81, %2 : vector<1x256xf32>
    %87 = arith.andi %85, %86 : vector<1x256xi1>
    %cst_30 = arith.constant 0.000000e+00 : f32
    %cst_31 = arith.constant -1.000000e+30 : f32
    %88 = vector.broadcast %cst_30 : f32 to vector<1x256xf32>
    %89 = vector.broadcast %cst_31 : f32 to vector<1x256xf32>
    %90 = arith.select %87, %88, %89 : vector<1x256xi1>, vector<1x256xf32>
    %c0_32 = arith.constant 0 : index
    %c0_33 = arith.constant 0 : index
    %91 = vector.load %arg2[%c0_32, %c0_33] : memref<4x8xbf16, #tpu.memory_space<vmem>>, vector<4x8xbf16>
    %c0_34 = arith.constant 0 : index
    %c0_35 = arith.constant 0 : index
    %c0_36 = arith.constant 0 : index
    %92 = vector.load %arg1[%c0_34, %c0_35, %c0_36] : memref<1x8x256xbf16, #tpu.memory_space<vmem>>, vector<1x8x256xbf16>
    %93 = vector.shape_cast %92 : vector<1x8x256xbf16> to vector<8x256xbf16>
    %cst_37 = arith.constant dense<0.000000e+00> : vector<4x256xf32>
    %94 = tpu.matmul %91, %93, %cst_37 {dimension_numbers = #tpu.dot_dimension_numbers<[1], [0], [0], [1], [0, 0, 1, 1], [], []>} : vector<4x8xbf16>, vector<8x256xbf16>, vector<4x256xf32> -> vector<4x256xf32>
    %c0_38 = arith.constant 0 : index
    %c0_39 = arith.constant 0 : index
    %95 = vector.load %arg3[%c0_38, %c0_39] : memref<4x1xf32, #tpu.memory_space<vmem>>, vector<4x1xf32>
    %96 = vector.broadcast %95 : vector<4x1xf32> to vector<4x256xf32>
    %97 = arith.addf %94, %96 : vector<4x256xf32>
    %cst_40 = arith.constant 0.000000e+00 : f32
    %98 = vector.broadcast %cst_40 : f32 to vector<4x256xf32>
    %99 = arith.subf %98, %97 : vector<4x256xf32>
    %100 = math.exp %99 : vector<4x256xf32>
    %cst_41 = arith.constant 1.000000e+00 : f32
    %101 = vector.broadcast %cst_41 : f32 to vector<4x256xf32>
    %102 = arith.addf %101, %100 : vector<4x256xf32>
    %103 = tpu.reciprocal %102 {approx = true} : vector<4x256xf32> -> vector<4x256xf32>
    %104 = arith.mulf %97, %103 : vector<4x256xf32>
    %c1_i32_42 = arith.constant 1 : i32
    %105 = tpu.dynamic_rotate %104 by %c1_i32_42 dim 1 : vector<4x256xf32>, i32 -> vector<4x256xf32>
    %106 = vector.broadcast %13 : vector<1x256xf32> to vector<4x256xf32>
    %107 = arith.addf %105, %106 : vector<4x256xf32>
    %108 = arith.maximumf %104, %107 : vector<4x256xf32>
    %c255_i32_43 = arith.constant 255 : i32
    %109 = tpu.dynamic_rotate %104 by %c255_i32_43 dim 1 : vector<4x256xf32>, i32 -> vector<4x256xf32>
    %110 = vector.broadcast %24 : vector<1x256xf32> to vector<4x256xf32>
    %111 = arith.addf %109, %110 : vector<4x256xf32>
    %112 = arith.maximumf %108, %111 : vector<4x256xf32>
    %c2_i32_44 = arith.constant 2 : i32
    %113 = tpu.dynamic_rotate %104 by %c2_i32_44 dim 1 : vector<4x256xf32>, i32 -> vector<4x256xf32>
    %114 = vector.broadcast %57 : vector<1x256xf32> to vector<4x256xf32>
    %115 = arith.addf %113, %114 : vector<4x256xf32>
    %116 = arith.maximumf %112, %115 : vector<4x256xf32>
    %c254_i32_45 = arith.constant 254 : i32
    %117 = tpu.dynamic_rotate %104 by %c254_i32_45 dim 1 : vector<4x256xf32>, i32 -> vector<4x256xf32>
    %118 = vector.broadcast %68 : vector<1x256xf32> to vector<4x256xf32>
    %119 = arith.addf %117, %118 : vector<4x256xf32>
    %120 = arith.maximumf %116, %119 : vector<4x256xf32>
    %c16_i32_46 = arith.constant 16 : i32
    %121 = tpu.dynamic_rotate %120 by %c16_i32_46 dim 1 : vector<4x256xf32>, i32 -> vector<4x256xf32>
    %122 = vector.broadcast %35 : vector<1x256xf32> to vector<4x256xf32>
    %123 = arith.addf %121, %122 : vector<4x256xf32>
    %124 = arith.maximumf %120, %123 : vector<4x256xf32>
    %c240_i32_47 = arith.constant 240 : i32
    %125 = tpu.dynamic_rotate %120 by %c240_i32_47 dim 1 : vector<4x256xf32>, i32 -> vector<4x256xf32>
    %126 = vector.broadcast %46 : vector<1x256xf32> to vector<4x256xf32>
    %127 = arith.addf %125, %126 : vector<4x256xf32>
    %128 = arith.maximumf %124, %127 : vector<4x256xf32>
    %c32_i32_48 = arith.constant 32 : i32
    %129 = tpu.dynamic_rotate %120 by %c32_i32_48 dim 1 : vector<4x256xf32>, i32 -> vector<4x256xf32>
    %130 = vector.broadcast %79 : vector<1x256xf32> to vector<4x256xf32>
    %131 = arith.addf %129, %130 : vector<4x256xf32>
    %132 = arith.maximumf %128, %131 : vector<4x256xf32>
    %c224_i32_49 = arith.constant 224 : i32
    %133 = tpu.dynamic_rotate %120 by %c224_i32_49 dim 1 : vector<4x256xf32>, i32 -> vector<4x256xf32>
    %134 = vector.broadcast %90 : vector<1x256xf32> to vector<4x256xf32>
    %135 = arith.addf %133, %134 : vector<4x256xf32>
    %136 = arith.maximumf %132, %135 : vector<4x256xf32>
    %c1_i32_50 = arith.constant 1 : i32
    %137 = tpu.dynamic_rotate %136 by %c1_i32_50 dim 1 : vector<4x256xf32>, i32 -> vector<4x256xf32>
    %138 = vector.broadcast %13 : vector<1x256xf32> to vector<4x256xf32>
    %139 = arith.addf %137, %138 : vector<4x256xf32>
    %140 = arith.maximumf %136, %139 : vector<4x256xf32>
    %c255_i32_51 = arith.constant 255 : i32
    %141 = tpu.dynamic_rotate %136 by %c255_i32_51 dim 1 : vector<4x256xf32>, i32 -> vector<4x256xf32>
    %142 = vector.broadcast %24 : vector<1x256xf32> to vector<4x256xf32>
    %143 = arith.addf %141, %142 : vector<4x256xf32>
    %144 = arith.maximumf %140, %143 : vector<4x256xf32>
    %c2_i32_52 = arith.constant 2 : i32
    %145 = tpu.dynamic_rotate %136 by %c2_i32_52 dim 1 : vector<4x256xf32>, i32 -> vector<4x256xf32>
    %146 = vector.broadcast %57 : vector<1x256xf32> to vector<4x256xf32>
    %147 = arith.addf %145, %146 : vector<4x256xf32>
    %148 = arith.maximumf %144, %147 : vector<4x256xf32>
    %c254_i32_53 = arith.constant 254 : i32
    %149 = tpu.dynamic_rotate %136 by %c254_i32_53 dim 1 : vector<4x256xf32>, i32 -> vector<4x256xf32>
    %150 = vector.broadcast %68 : vector<1x256xf32> to vector<4x256xf32>
    %151 = arith.addf %149, %150 : vector<4x256xf32>
    %152 = arith.maximumf %148, %151 : vector<4x256xf32>
    %c16_i32_54 = arith.constant 16 : i32
    %153 = tpu.dynamic_rotate %152 by %c16_i32_54 dim 1 : vector<4x256xf32>, i32 -> vector<4x256xf32>
    %154 = vector.broadcast %35 : vector<1x256xf32> to vector<4x256xf32>
    %155 = arith.addf %153, %154 : vector<4x256xf32>
    %156 = arith.maximumf %152, %155 : vector<4x256xf32>
    %c240_i32_55 = arith.constant 240 : i32
    %157 = tpu.dynamic_rotate %152 by %c240_i32_55 dim 1 : vector<4x256xf32>, i32 -> vector<4x256xf32>
    %158 = vector.broadcast %46 : vector<1x256xf32> to vector<4x256xf32>
    %159 = arith.addf %157, %158 : vector<4x256xf32>
    %160 = arith.maximumf %156, %159 : vector<4x256xf32>
    %c32_i32_56 = arith.constant 32 : i32
    %161 = tpu.dynamic_rotate %152 by %c32_i32_56 dim 1 : vector<4x256xf32>, i32 -> vector<4x256xf32>
    %162 = vector.broadcast %79 : vector<1x256xf32> to vector<4x256xf32>
    %163 = arith.addf %161, %162 : vector<4x256xf32>
    %164 = arith.maximumf %160, %163 : vector<4x256xf32>
    %c224_i32_57 = arith.constant 224 : i32
    %165 = tpu.dynamic_rotate %152 by %c224_i32_57 dim 1 : vector<4x256xf32>, i32 -> vector<4x256xf32>
    %166 = vector.broadcast %90 : vector<1x256xf32> to vector<4x256xf32>
    %167 = arith.addf %165, %166 : vector<4x256xf32>
    %168 = arith.maximumf %164, %167 : vector<4x256xf32>
    %c1_i32_58 = arith.constant 1 : i32
    %169 = tpu.dynamic_rotate %168 by %c1_i32_58 dim 1 : vector<4x256xf32>, i32 -> vector<4x256xf32>
    %170 = vector.broadcast %13 : vector<1x256xf32> to vector<4x256xf32>
    %171 = arith.addf %169, %170 : vector<4x256xf32>
    %172 = arith.maximumf %168, %171 : vector<4x256xf32>
    %c255_i32_59 = arith.constant 255 : i32
    %173 = tpu.dynamic_rotate %168 by %c255_i32_59 dim 1 : vector<4x256xf32>, i32 -> vector<4x256xf32>
    %174 = vector.broadcast %24 : vector<1x256xf32> to vector<4x256xf32>
    %175 = arith.addf %173, %174 : vector<4x256xf32>
    %176 = arith.maximumf %172, %175 : vector<4x256xf32>
    %c2_i32_60 = arith.constant 2 : i32
    %177 = tpu.dynamic_rotate %168 by %c2_i32_60 dim 1 : vector<4x256xf32>, i32 -> vector<4x256xf32>
    %178 = vector.broadcast %57 : vector<1x256xf32> to vector<4x256xf32>
    %179 = arith.addf %177, %178 : vector<4x256xf32>
    %180 = arith.maximumf %176, %179 : vector<4x256xf32>
    %c254_i32_61 = arith.constant 254 : i32
    %181 = tpu.dynamic_rotate %168 by %c254_i32_61 dim 1 : vector<4x256xf32>, i32 -> vector<4x256xf32>
    %182 = vector.broadcast %68 : vector<1x256xf32> to vector<4x256xf32>
    %183 = arith.addf %181, %182 : vector<4x256xf32>
    %184 = arith.maximumf %180, %183 : vector<4x256xf32>
    %c16_i32_62 = arith.constant 16 : i32
    %185 = tpu.dynamic_rotate %184 by %c16_i32_62 dim 1 : vector<4x256xf32>, i32 -> vector<4x256xf32>
    %186 = vector.broadcast %35 : vector<1x256xf32> to vector<4x256xf32>
    %187 = arith.addf %185, %186 : vector<4x256xf32>
    %188 = arith.maximumf %184, %187 : vector<4x256xf32>
    %c240_i32_63 = arith.constant 240 : i32
    %189 = tpu.dynamic_rotate %184 by %c240_i32_63 dim 1 : vector<4x256xf32>, i32 -> vector<4x256xf32>
    %190 = vector.broadcast %46 : vector<1x256xf32> to vector<4x256xf32>
    %191 = arith.addf %189, %190 : vector<4x256xf32>
    %192 = arith.maximumf %188, %191 : vector<4x256xf32>
    %c32_i32_64 = arith.constant 32 : i32
    %193 = tpu.dynamic_rotate %184 by %c32_i32_64 dim 1 : vector<4x256xf32>, i32 -> vector<4x256xf32>
    %194 = vector.broadcast %79 : vector<1x256xf32> to vector<4x256xf32>
    %195 = arith.addf %193, %194 : vector<4x256xf32>
    %196 = arith.maximumf %192, %195 : vector<4x256xf32>
    %c224_i32_65 = arith.constant 224 : i32
    %197 = tpu.dynamic_rotate %184 by %c224_i32_65 dim 1 : vector<4x256xf32>, i32 -> vector<4x256xf32>
    %198 = vector.broadcast %90 : vector<1x256xf32> to vector<4x256xf32>
    %199 = arith.addf %197, %198 : vector<4x256xf32>
    %200 = arith.maximumf %196, %199 : vector<4x256xf32>
    %c0_66 = arith.constant 0 : index
    %c0_67 = arith.constant 0 : index
    %c0_68 = arith.constant 0 : index
    %201 = vector.load %arg4[%c0_66, %c0_67, %c0_68] : memref<4x16x4xbf16, #tpu.memory_space<vmem>>, vector<1x16x4xbf16>
    %202 = vector.shape_cast %201 : vector<1x16x4xbf16> to vector<16x4xbf16>
    %203 = arith.truncf %104 : vector<4x256xf32> to vector<4x256xbf16>
    %cst_69 = arith.constant dense<0.000000e+00> : vector<16x256xf32>
    %204 = tpu.matmul %202, %203, %cst_69 {dimension_numbers = #tpu.dot_dimension_numbers<[1], [0], [0], [1], [0, 0, 1, 1], [], []>} : vector<16x4xbf16>, vector<4x256xbf16>, vector<16x256xf32> -> vector<16x256xf32>
    %c1 = arith.constant 1 : index
    %c0_70 = arith.constant 0 : index
    %c0_71 = arith.constant 0 : index
    %205 = vector.load %arg4[%c1, %c0_70, %c0_71] : memref<4x16x4xbf16, #tpu.memory_space<vmem>>, vector<1x16x4xbf16>
    %206 = vector.shape_cast %205 : vector<1x16x4xbf16> to vector<16x4xbf16>
    %207 = arith.truncf %136 : vector<4x256xf32> to vector<4x256xbf16>
    %cst_72 = arith.constant dense<0.000000e+00> : vector<16x256xf32>
    %208 = tpu.matmul %206, %207, %cst_72 {dimension_numbers = #tpu.dot_dimension_numbers<[1], [0], [0], [1], [0, 0, 1, 1], [], []>} : vector<16x4xbf16>, vector<4x256xbf16>, vector<16x256xf32> -> vector<16x256xf32>
    %209 = arith.addf %204, %208 : vector<16x256xf32>
    %c2 = arith.constant 2 : index
    %c0_73 = arith.constant 0 : index
    %c0_74 = arith.constant 0 : index
    %210 = vector.load %arg4[%c2, %c0_73, %c0_74] : memref<4x16x4xbf16, #tpu.memory_space<vmem>>, vector<1x16x4xbf16>
    %211 = vector.shape_cast %210 : vector<1x16x4xbf16> to vector<16x4xbf16>
    %212 = arith.truncf %168 : vector<4x256xf32> to vector<4x256xbf16>
    %cst_75 = arith.constant dense<0.000000e+00> : vector<16x256xf32>
    %213 = tpu.matmul %211, %212, %cst_75 {dimension_numbers = #tpu.dot_dimension_numbers<[1], [0], [0], [1], [0, 0, 1, 1], [], []>} : vector<16x4xbf16>, vector<4x256xbf16>, vector<16x256xf32> -> vector<16x256xf32>
    %214 = arith.addf %209, %213 : vector<16x256xf32>
    %c3 = arith.constant 3 : index
    %c0_76 = arith.constant 0 : index
    %c0_77 = arith.constant 0 : index
    %215 = vector.load %arg4[%c3, %c0_76, %c0_77] : memref<4x16x4xbf16, #tpu.memory_space<vmem>>, vector<1x16x4xbf16>
    %216 = vector.shape_cast %215 : vector<1x16x4xbf16> to vector<16x4xbf16>
    %217 = arith.truncf %200 : vector<4x256xf32> to vector<4x256xbf16>
    %cst_78 = arith.constant dense<0.000000e+00> : vector<16x256xf32>
    %218 = tpu.matmul %216, %217, %cst_78 {dimension_numbers = #tpu.dot_dimension_numbers<[1], [0], [0], [1], [0, 0, 1, 1], [], []>} : vector<16x4xbf16>, vector<4x256xbf16>, vector<16x256xf32> -> vector<16x256xf32>
    %219 = arith.addf %214, %218 : vector<16x256xf32>
    %c0_79 = arith.constant 0 : index
    %c0_80 = arith.constant 0 : index
    %220 = vector.load %arg5[%c0_79, %c0_80] : memref<16x1xf32, #tpu.memory_space<vmem>>, vector<16x1xf32>
    %221 = vector.broadcast %220 : vector<16x1xf32> to vector<16x256xf32>
    %222 = arith.addf %219, %221 : vector<16x256xf32>
    %cst_81 = arith.constant 0.000000e+00 : f32
    %223 = vector.broadcast %cst_81 : f32 to vector<16x256xf32>
    %224 = arith.subf %223, %222 : vector<16x256xf32>
    %225 = math.exp %224 : vector<16x256xf32>
    %cst_82 = arith.constant 1.000000e+00 : f32
    %226 = vector.broadcast %cst_82 : f32 to vector<16x256xf32>
    %227 = arith.addf %226, %225 : vector<16x256xf32>
    %228 = tpu.reciprocal %227 {approx = true} : vector<16x256xf32> -> vector<16x256xf32>
    %229 = arith.mulf %222, %228 : vector<16x256xf32>
    %c0_83 = arith.constant 0 : index
    %c0_84 = arith.constant 0 : index
    %c0_85 = arith.constant 0 : index
    %230 = vector.load %arg7[%c0_83, %c0_84, %c0_85] : memref<1x16x256xf32, #tpu.memory_space<vmem>>, vector<1x16x256xf32>
    %231 = vector.shape_cast %230 : vector<1x16x256xf32> to vector<16x256xf32>
    %232 = vector.shape_cast %229 : vector<16x256xf32> to vector<1x16x256xf32>
    tpu.vector_store %arg7[%c0_83, %c0_84, %c0_85], %232 {strides = array<i32>} : memref<1x16x256xf32, #tpu.memory_space<vmem>>, vector<1x16x256xf32>,
    return
  }
  func.func @transform_0(%arg0: i32) -> (i32, i32, i32) {
    %c0_i32 = arith.constant 0 : i32
    %c0_i32_0 = arith.constant 0 : i32
    %c0_i32_1 = arith.constant 0 : i32
    return %arg0, %c0_i32, %c0_i32_0 : i32, i32, i32
  }
  func.func @transform_1(%arg0: i32) -> (i32, i32) {
    %c0_i32 = arith.constant 0 : i32
    %c0_i32_0 = arith.constant 0 : i32
    %c0_i32_1 = arith.constant 0 : i32
    return %c0_i32, %c0_i32_0 : i32, i32
  }
  func.func @transform_2(%arg0: i32) -> (i32, i32) {
    %c0_i32 = arith.constant 0 : i32
    %c0_i32_0 = arith.constant 0 : i32
    %c0_i32_1 = arith.constant 0 : i32
    return %c0_i32, %c0_i32_0 : i32, i32
  }
  func.func @transform_3(%arg0: i32) -> (i32, i32, i32) {
    %c0_i32 = arith.constant 0 : i32
    %c0_i32_0 = arith.constant 0 : i32
    %c0_i32_1 = arith.constant 0 : i32
    %c0_i32_2 = arith.constant 0 : i32
    return %c0_i32, %c0_i32_0, %c0_i32_1 : i32, i32, i32
  }
  func.func @transform_4(%arg0: i32) -> (i32, i32) {
    %c0_i32 = arith.constant 0 : i32
    %c0_i32_0 = arith.constant 0 : i32
    %c0_i32_1 = arith.constant 0 : i32
    return %c0_i32, %c0_i32_0 : i32, i32
  }
  func.func @transform_5(%arg0: i32) -> (i32, i32) {
    %c0_i32 = arith.constant 0 : i32
    %c0_i32_0 = arith.constant 0 : i32
    %c0_i32_1 = arith.constant 0 : i32
    return %c0_i32, %c0_i32_0 : i32, i32
  }
  func.func @transform_6(%arg0: i32) -> (i32, i32, i32) {
    %c0_i32 = arith.constant 0 : i32
    %c0_i32_0 = arith.constant 0 : i32
    %c0_i32_1 = arith.constant 0 : i32
    return %arg0, %c0_i32, %c0_i32_0 : i32, i32, i32
  }
}

</mosaic_0001>

<bundles_post_ra>
// kernel: tile.9
= control target key start
LH: loop header
LB: loop body
LE: loop exit
PB: predicated region body
PF: predicated region fallthrough
CT: control target
= control target key end

     0   :  { %s7_s6 = smov 3  ;;  %s21_s9 = smov 3  ;;  %vm4_vm0 = vcmask 130048   ;;  %vm11_vm1 = vcmask 1048448   ;;  %vm18_vm2 = vcmask 917248   ;;  %vm25_vm3 = vcmask 786048   ;;  %s128_s0 = inlined_call_operand.vmem [shape: f32[16,16], index: 0, kind: input, shape index: {}]   ;;  %s129_s1 = inlined_call_operand.vmem [shape: f32[1,256], index: 1, kind: output, shape index: {}]  }
   0x1   :  { %v66_v0 = vld [vmem:[%s128_s0 + $0x7] ss:$8 sm:%s7_s6]   ;;  %s81_s10 = smov 112   ;;  %v68_v1 = vld [vmem:[%s128_s0 + $0x5] ss:$8 sm:%s21_s9]   ;;  %s14_s13 = smov 3 }
   0x2   :  { %9 = vrot.lane.b32.xlu0 %v66_v0, %s81_s10  ;;  %s82_s14 = smov 80   ;;  %v67_v2 = vld [vmem:[%s128_s0 + $0x6] ss:$8 sm:%s14_s13]   ;;  %s28_s17 = smov 3  ;;  %vm32_vm4 = vcmask 654848   ;;  %vm39_vm5 = vcmask 523648  }
   0x3   :  { %23 = vrot.lane.b32.xlu1 %v68_v1, %s82_s14  ;;  %v69_v3 = vld [vmem:[%s128_s0 + $0x4] ss:$8 sm:%s28_s17]   ;;  %s35_s20 = smov 3  ;;  %s42_s21 = smov 3  ;;  %vm46_vm6 = vcmask 392448   ;;  %vm53_vm7 = vcmask 261248  }
   0x4   :  { %s83_s22 = smov 96   ;;  %s84_s23 = smov 64   ;;  %v70_v4 = vld [vmem:[%s128_s0 + $0x3] ss:$8 sm:%s35_s20]   ;;  %v71_v5 = vld [vmem:[%s128_s0 + $0x2] ss:$8 sm:%s42_s21]  }
   0x5   :  { %s2_s26 = smov 3  ;;  %s49_s29 = smov 3 }
   0x6   :  { %16 = vrot.lane.b32.xlu0 %v67_v2, %s83_s22  ;;  %v3_v6 = vld [vmem:[%s128_s0] ss:$8 sm:%s2_s26]   ;;  %s85_s3 = smov 48   ;;  %s86_s4 = smov 32  }
   0x7   :  { %30 = vrot.lane.b32.xlu1 %v69_v3, %s84_s23  ;;  %5 = vst.msk [vmem:[#allocation0] ss:$8 sm:$0x3] %vm4_vm0, %v3_v6   ;;  %v72_v7 = vld [vmem:[%s128_s0 + $0x1] ss:$8 sm:%s49_s29]   ;;  %s87_s0 = smov 16  }
   0xa   :  { %37 = vrot.lane.b32.xlu0 %v70_v4, %s85_s3 }
   0xb   :  { %44 = vrot.lane.b32.xlu1 %v71_v5, %s86_s4 }
   0xe   :  { %51 = vrot.lane.b32.xlu0 %v72_v7, %s87_s0 }
  0x74   :  { %v10_v8 = vpop.permute.xlu0 %9  }
  0x75   :  { %12 = vst.msk [vmem:[#allocation0] ss:$8 sm:$0x3] %vm11_vm1, %v10_v8   ;;  %v24_v9 = vpop.permute.xlu1 %23  }
  0x78   :  { %v17_v10 = vpop.permute.xlu0 %16  }
  0x79   :  { %19 = vst.msk [vmem:[#allocation0] ss:$8 sm:$0x3] %vm18_vm2, %v17_v10   ;;  %v31_v11 = vpop.permute.xlu1 %30  }
  0x7a   :  { %26 = vst.msk [vmem:[#allocation0] ss:$8 sm:$0x3] %vm25_vm3, %v24_v9  }
  0x7b   :  { %33 = vst.msk [vmem:[#allocation0] ss:$8 sm:$0x3] %vm32_vm4, %v31_v11  }
  0x7c   :  { %v38_v12 = vpop.permute.xlu0 %37  }
  0x7d   :  { %40 = vst.msk [vmem:[#allocation0] ss:$8 sm:$0x3] %vm39_vm5, %v38_v12   ;;  %v45_v13 = vpop.permute.xlu1 %44  }
  0x7e   :  { %47 = vst.msk [vmem:[#allocation0] ss:$8 sm:$0x3] %vm46_vm6, %v45_v13  }
  0x80   :  { %v52_v14 = vpop.permute.xlu0 %51  }
  0x81   :  { %54 = vst.msk [vmem:[#allocation0] ss:$8 sm:$0x3] %vm53_vm7, %v52_v14  }
  0x88   :  { %v58_v15 = vld [vmem:[#allocation0] sm:$0x1]  ;;  %v62_v16 = vld [vmem:[#allocation0 + $0x8] sm:$0x1] }
  0x89   :  { %60 = vst [vmem:[%s129_s1] sm:$0x1] %v58_v15  ;;  %73 = vst [vmem:[%s129_s1 + $0x1] sm:$0x1] %v62_v16 }

// kernel: _sppf_pallas_forward.1
= control target key start
LH: loop header
LB: loop body
LE: loop exit
PB: predicated region body
PF: predicated region fallthrough
CT: control target
= control target key end

     0   :  { %s1364_s21 = smov 0   ;;  %s1928_s0 = inlined_call_operand.vmem [shape: bf16[2,8,256], index: 0, kind: input, shape index: {}]   ;;  %s1929_s1 = inlined_call_operand.vmem [shape: bf16[4,8], index: 1, kind: input, shape index: {}]   ;;  %s1930_s2 = inlined_call_operand.vmem [shape: f32[4,1], index: 2, kind: input, shape index: {}]   ;;  %s1931_s3 = inlined_call_operand.vmem [shape: bf16[4,16,4], index: 3, kind: input, shape index: {}]   ;;  %s1932_s4 = inlined_call_operand.vmem [shape: f32[16,1], index: 4, kind: input, shape index: {}]   ;;  %s1933_s5 = inlined_call_operand.vmem [shape: f32[2,256], index: 5, kind: input, shape index: {}]   ;;  %s1934_s6 = inlined_call_operand.vmem [shape: f32[2,16,256], index: 6, kind: output, shape index: {}]  }
   0x1 LB: > { %s1214_s22 = sadd.s32 4294967295, %s1317_s21   ;;  %p1218_p0 = scmp.ge.s32.totalorder %s1317_s21, 1  ;;  %s1317_s21 = sphi %s1364_s21, %s16_s21  }
   0x2   : > { %p212_p1 = scmp.lt.s32.totalorder %s1317_s21, 3 }
   0x4   : > { %p213_p2 = pnand %p1218_p0, %p212_p1 }
   0x5   : > { %p242_p3 = scmp.lt.s32.totalorder (!%p213_p2), %s1214_s22, 1  ;;  %v255_v0 = vlaneseq (!%p213_p2)  ;;  %v1319_v1 = vmov (!%p213_p2), 0   ;;  %v479_v2 = vld [vmem:[%s1930_s2] sm:$0xf] (!%p213_p2)  ;;  %vm494_vm0 = vcmask (!%p213_p2), 1043456   ;;  %s1320_s7 = smov (!%p213_p2), 1  }
   0x6   : > { %216 = sbr.rel (%p213_p2) target bundleno = 1316 (0x524), region = 44  ;;  %533 = vmatprep.mubr.bf16.mxu0 (!%p213_p2), %v1319_v1  ;;  %1279 = vset.pattern.permute.xlu0 (!%p213_p2), %v1319_v1  ;;  %v253_v3 = vld [vmem:[%s1933_s5] sm:$0xf] (!%p213_p2)  ;;  %vm490_vm1 = vcmask (!%p213_p2), 64512   ;;  %s1321_s10 = smov (!%p213_p2), 127   ;;  %vm1935_vm2 = vcmask (!%p213_p2), 1041408  }
   0x7   : > { %482 = vperm.xlu0 (!%p213_p2), %1279, %v479_v2   ;;  %v256_v4 = vshrl.u32 (!%p213_p2), %v255_v0, 7  ;;  %972 = vmatprep.mubr.bf16.mxu1 (!%p213_p2), %v1319_v1  ;;  %v477_v13 = vld [vmem:[%s1929_s1] sm:$0x3] (!%p213_p2)  ;;  %s1322_s11 = smov (!%p213_p2), 2   ;;  %s1323_s12 = smov (!%p213_p2), 126   ;;  %v1495_v48 = vand.u32 (!%p213_p2), 127, %v255_v0 }
   0x8   : > { %1280 = vset.pattern.permute.xlu1 (!%p213_p2), %v1319_v1  ;;  %s1324_s13 = smov (!%p213_p2), 16   ;;  %s1325_s14 = smov (!%p213_p2), 112  }
   0x9   : > { %v280_v5 = vsub.s32 (!%p213_p2), 3, %v256_v4  ;;  %v276_v6 = vsub.s32 (!%p213_p2), 1, %v256_v4  ;;  %v1405_v14 = vsub.s32 (!%p213_p2), 0, %v256_v4  ;;  %v261_v15 = vsub.s32 (!%p213_p2), 2, %v256_v4  ;;  %s1326_s15 = smov (!%p213_p2), 32   ;;  %s1327_s16 = smov (!%p213_p2), 96  }
   0xa   : > { %vm1937_vm3 = vcmp.lt.s32.totalorder (!%p213_p2), %v1495_v48, 1  ;;  %vm1936_vm4 = vcmp.lt.s32.totalorder (!%p213_p2), %v1495_v48, 127  ;;  %vm1939_vm5 = vcmp.lt.s32.totalorder (!%p213_p2), %v1495_v48, 2  ;;  %vm1938_vm6 = vcmp.lt.s32.totalorder (!%p213_p2), %v1495_v48, 126 }
   0xb   : > { %v1389_v8 = vrot.slane (!%p213_p2), %v253_v3, %v280_v5  ;;  %v1391_v9 = vrot.slane (!%p213_p2), %v253_v3, %v276_v6  ;;  %v1407_v16 = vrot.slane (!%p213_p2), %v253_v3, %v261_v15  ;;  %v1410_v17 = vrot.slane (!%p213_p2), %v253_v3, %v1405_v14 }
   0xd   : > { %s2001_s22 = smov (!%p242_p3, %s1214_s22), 1  ;;  %286 = vrot.lane.b32.xlu1 %v1389_v8, %s1320_s7  ;;  %284 = vrot.lane.b32.xlu0 %v1391_v9, %s1320_s7 }
   0xe   : > { %s1247_s27 = sshll.u32 %s2001_s22, 3 }
   0xf   : > { %s246_s30 = scalar_lea.vmem %s1928_s0, %s1247_s27 }
  0x10   : > { %v478_v7 = vld [vmem:[%s246_s30] sm:$0xff] }
  0x11   : > { %v1224_v10 = vcombine.high %v478_v7, %v478_v7  ;;  %v1223_v11 = vcombine.low %v478_v7, %v478_v7  ;;  %309 = vrot.lane.b32.xlu1 %v1391_v9, %s1321_s10  ;;  %311 = vrot.lane.b32.xlu0 %v1389_v8, %s1321_s10 }
  0x13   : > { %1225 = vmatprep.subr.msk.bf16.mxu0 %vm494_vm0, %v1224_v10  ;;  %v496_v12 = vsel %vm494_vm0, %v1223_v11, 0 }
  0x14   : > { %502 = vmatpush1.bf16.msra.mxu0 %v496_v12 }
  0x15   : > { %267 = vrot.lane.b32.xlu0 %v1407_v16, %s1320_s7  ;;  %265 = vrot.lane.b32.xlu1 %v1410_v17, %s1320_s7 }
  0x17   : > { %1226 = vmatmul.mubr.msk.bf16.vlgmr.msra.gmra.mrb[0].mxu0 %vm490_vm1, %v477_v13 }
  0x18   : > { %915 = vmatprep.mubr.bf16.mxu0 %v1319_v1 }
  0x19   : > { %386 = vrot.lane.b32.xlu0 %v1389_v8, %s1322_s11  ;;  %384 = vrot.lane.b32.xlu1 %v1391_v9, %s1322_s11 }
  0x1d   : > { %304 = vrot.lane.b32.xlu0 %v1407_v16, %s1321_s10  ;;  %302 = vrot.lane.b32.xlu1 %v1410_v17, %s1321_s10 }
  0x21   : > { %411 = vrot.lane.b32.xlu0 %v1389_v8, %s1323_s12  ;;  %409 = vrot.lane.b32.xlu1 %v1391_v9, %s1323_s12 }
  0x25   : > { %379 = vrot.lane.b32.xlu0 %v1407_v16, %s1322_s11  ;;  %377 = vrot.lane.b32.xlu1 %v1410_v17, %s1322_s11 }
  0x29   : > { %404 = vrot.lane.b32.xlu0 %v1407_v16, %s1323_s12  ;;  %402 = vrot.lane.b32.xlu1 %v1410_v17, %s1323_s12 }
  0x7f   : > { %v287_v40 = vpop.permute.xlu1 %286 }
  0x83   : > { %v310_v42 = vpop.permute.xlu1 %309 }
  0x86   : > { %v483_v18 = vpop.permute.xlu0 %482 }
  0x87   : > { %v266_v44 = vpop.permute.xlu1 %265 }
  0x8a   : > { %v285_v41 = vpop.permute.xlu0 %284 }
  0x8b   : > { %v385_v46 = vpop.permute.xlu1 %384  ;;  %v288_v51 = vsel %vm1937_vm3, %v285_v41, %v287_v40  ;;  %v289_v52 = vsel %vm1937_vm3, %v287_v40, %v285_v41 }
  0x8c   : > { %v292_v54 = vsub.f32 %v289_v52, %v1391_v9  ;;  %v293_v55 = vsub.f32 %v288_v51, %v1389_v8 }
  0x8e   : > { %v312_v43 = vpop.permute.xlu0 %311  ;;  %v294_v63 = vand.u32 2147483647, %v292_v54  ;;  %v295_v0 = vand.u32 2147483647, %v293_v55 }
  0x8f   : > { %v303_v49 = vpop.permute.xlu1 %302  ;;  %v313_v53 = vsel %vm1936_vm4, %v310_v42, %v312_v43  ;;  %v314_v56 = vsel %vm1936_vm4, %v312_v43, %v310_v42 }
  0x90   : > { %v317_v58 = vsub.f32 %v313_v53, %v1391_v9  ;;  %v318_v61 = vsub.f32 %v314_v56, %v1389_v8  ;;  %vm296_vm7 = vcmp.eq.f32.partialorder %v294_v63, 1.0  ;;  %vm297_vm8 = vcmp.eq.f32.partialorder %v295_v0, 1.0 }
  0x92   : > { %v268_v45 = vpop.permute.xlu0 %267  ;;  %v319_v2 = vand.u32 2147483647, %v317_v58  ;;  %v320_v11 = vand.u32 2147483647, %v318_v61 }
  0x93   : > { %v410_v57 = vpop.permute.xlu1 %409  ;;  %v273_v3 = vsel %vm1937_vm3, %v268_v45, %v266_v44  ;;  %v272_v5 = vsel %vm1937_vm3, %v266_v44, %v268_v45 }
  0x94   : > { %vm290_vm9 = vcmp.eq.f32.partialorder %v273_v3, %v1410_v17  ;;  %vm321_vm10 = vcmp.eq.f32.partialorder %v319_v2, 1.0  ;;  %vm291_vm11 = vcmp.eq.f32.partialorder %v272_v5, %v1407_v16  ;;  %vm322_vm13 = vcmp.eq.f32.partialorder %v320_v11, 1.0 }
  0x95   : > { %vm1538_vm14 = vmand %vm290_vm9, %vm296_vm7 }
  0x96   : > { %v387_v47 = vpop.permute.xlu0 %386  ;;  %vm299_vm0 = vmand %vm291_vm11, %vm297_vm8 }
  0x97   : > { %v389_v60 = vsel %vm1939_vm5, %v387_v47, %v385_v46  ;;  %v388_v62 = vsel %vm1939_vm5, %v385_v46, %v387_v47  ;;  %v378_v10 = vpop.permute.xlu1 %377 }
  0x98   : > { %v392_v4 = vsub.f32 %v389_v60, %v1391_v9  ;;  %v393_v6 = vsub.f32 %v388_v62, %v1389_v8 }
  0x9a   : > { %v305_v50 = vpop.permute.xlu0 %304 }
  0x9b   : > { %v307_v12 = vsel %vm1936_vm4, %v303_v49, %v305_v50 }
  0x9c   : > { %vm315_vm12 = vcmp.eq.f32.partialorder %v307_v12, %v1410_v17 }
  0x9e   : > { %v412_v59 = vpop.permute.xlu0 %411 }
  0x9f   : > { %v413_v7 = vsel %vm1938_vm6, %v410_v57, %v412_v59  ;;  %v414_v13 = vsel %vm1938_vm6, %v412_v59, %v410_v57 }
  0xa2   : > { %v380_v15 = vpop.permute.xlu0 %379 }
  0xea   : > { %v535_v19 = vpop.f32.mrb[0].mxu0 }
  0xeb   : > { %v536_v20 = vadd.f32 %v535_v19, %v483_v18  ;;  %v537_v21 = vpop.f32.mrb[1].mxu0  ;;  %v394_v19 = vand.u32 2147483647, %v392_v4 }
  0xec   : > { %v538_v22 = vadd.f32 %v537_v21, %v483_v18  ;;  %v539_v23 = vpop.f32.mrb[2].mxu0  ;;  %v308_v18 = vsel %vm1936_vm4, %v305_v50, %v303_v49  ;;  %v395_v21 = vand.u32 2147483647, %v393_v6 }
  0xed   : > { %v542_v24 = vsub.f32 0.0, %v536_v20  ;;  %v540_v25 = vpop.f32.mrb[3].mxu0  ;;  %v383_v23 = vsel %vm1939_vm5, %v380_v15, %v378_v10  ;;  %vm316_vm15 = vcmp.eq.f32.partialorder %v308_v18, %v1407_v16  ;;  %vm396_vm1 = vcmp.eq.f32.partialorder %v394_v19, 2.0 }
  0xee   : > { %v543_v26 = vsub.f32 0.0, %v538_v22  ;;  %vm390_vm7 = vcmp.eq.f32.partialorder %v383_v23, %v1410_v17  ;;  %vm397_vm9 = vcmp.eq.f32.partialorder %v395_v21, 2.0  ;;  %vm324_vm4 = vmand %vm316_vm15, %vm322_vm13 }
  0xef   : > { %v544_v27 = vmul.f32 1.442695, %v542_v24  ;;  %v403_v24 = vpop.permute.xlu1 %402  ;;  %vm398_vm8 = vmand %vm390_vm7, %vm396_vm1  ;;  %vm1941_vm7 = vcmp.lt.s32.totalorder %v1495_v48, 16 }
  0xf0   : > { %v546_v28 = vmul.f32 1.442695, %v543_v26  ;;  %v382_v26 = vsel %vm1939_vm5, %v378_v10, %v380_v15 }
  0xf1   : > { %1287 = vpow2.f32 %v544_v27  ;;  %v405_v27 = vpop.permute.xlu0 %404  ;;  %vm391_vm3 = vcmp.eq.f32.partialorder %v382_v26, %v1407_v16 }
  0xf2   : > { %1289 = vpow2.f32 %v546_v28  ;;  %vm399_vm11 = vmand %vm391_vm3, %vm397_vm9  ;;  %vm1950_vm3 = vcmp.lt.s32.totalorder %v1495_v48, 127  ;;  %vm1940_vm9 = vcmp.lt.s32.totalorder %v1495_v48, 112 }
  0xfb   : > { %v1288_v29 = vpop.eup %1287 }
  0xfc   : > { %v1290_v30 = vpop.eup %1289  ;;  %v548_v31 = vadd.f32 1.0, %v1288_v29 }
  0xfd   : > { %v549_v32 = vadd.f32 1.0, %v1290_v30 }
  0xfe   : > { %1291 = vrcp.f32 %v548_v31  ;;  %v407_v31 = vsel %vm1938_vm6, %v403_v24, %v405_v27 }
  0xff   : > { %1293 = vrcp.f32 %v549_v32 }
 0x108   : > { %v1292_v33 = vpop.eup %1291 }
 0x109   : > { %v1294_v34 = vpop.eup %1293  ;;  %v1436_v35 = vmul.f32 %v1292_v33, %v536_v20  ;;  %v417_v20 = vsub.f32 %v413_v7, %v1391_v9  ;;  %v408_v33 = vsel %vm1938_vm6, %v405_v27, %v403_v24 }
 0x10a   : > { %v1438_v36 = vmul.f32 %v1294_v34, %v538_v22  ;;  %v418_v22 = vsub.f32 %v414_v13, %v1389_v8  ;;  %vm416_vm15 = vcmp.eq.f32.partialorder %v408_v33, %v1407_v16 }
 0x10b   : > { %554 = vrot.lane.b32.xlu1 %v1436_v35, %s1320_s7  ;;  %v860_v37 = vpack.c.bf16 %v1436_v35, %v1436_v35  ;;  %v419_v29 = vand.u32 2147483647, %v417_v20 }
 0x10c   : > { %556 = vrot.lane.b32.xlu0 %v1438_v36, %s1320_s7  ;;  %v861_v38 = vpack.c.bf16 %v1438_v36, %v1438_v36  ;;  %v420_v30 = vand.u32 2147483647, %v418_v22 }
 0x10d   : > { %v935_v39 = vsel %vm1935_vm2, %v860_v37, 0  ;;  %v1328_v37 = vmov -1e+30  }
 0x10e   : > { %1233 = vmatprep.subr.msk.bf16.mxu1 %vm1935_vm2, %v861_v38  ;;  %vm1547_vm2 = vmand %vm315_vm12, %vm321_vm10  ;;  %v300_v38 = vsel %vm1538_vm14, 0.0, %v1328_v37  ;;  %v326_v41 = vsel %vm324_vm4, 0.0, %v1328_v37  ;;  %vm421_vm10 = vcmp.eq.f32.partialorder %v419_v29, 2.0  ;;  %vm415_vm12 = vcmp.eq.f32.partialorder %v407_v31, %v1410_v17 }
 0x10f   : > { %572 = vrot.lane.b32.xlu1 %v1436_v35, %s1321_s10  ;;  %941 = vmatpush1.bf16.msra.mxu1 %v935_v39  ;;  %v301_v39 = vsel %vm299_vm0, 0.0, %v1328_v37  ;;  %v325_v40 = vsel %vm1547_vm2, 0.0, %v1328_v37  ;;  %vm422_vm13 = vcmp.eq.f32.partialorder %v420_v30, 2.0  ;;  %vm1948_vm14 = vcmp.lt.s32.totalorder %v1495_v48, 1  ;;  %vm423_vm2 = vmand %vm415_vm12, %vm421_vm10 }
 0x110   : > { %574 = vrot.lane.b32.xlu0 %v1438_v36, %s1321_s10  ;;  %vm1949_vm0 = vmmov %vm1948_vm14  ;;  %v1574_v45 = vrot.slane %v300_v38, %v1405_v14  ;;  %v1577_v46 = vrot.slane %v301_v39, %v1405_v14  ;;  %v400_v49 = vsel %vm398_vm8, 0.0, %v1328_v37  ;;  %v401_v50 = vsel %vm399_vm11, 0.0, %v1328_v37 }
 0x111   : > { %vm1951_vm4 = vmmov %vm1950_vm3  ;;  %v1586_v53 = vrot.slane %v325_v40, %v1405_v14  ;;  %v1589_v54 = vrot.slane %v326_v41, %v1405_v14  ;;  %v1595_v58 = vrot.slane %v400_v49, %v1405_v14  ;;  %v1598_v59 = vrot.slane %v401_v50, %v1405_v14 }
 0x112   : > { %vm424_vm1 = vmand %vm416_vm15, %vm422_vm13  ;;  %v425_v63 = vsel %vm423_vm2, 0.0, %v1328_v37  ;;  %vm1943_vm8 = vcmp.lt.s32.totalorder %v1495_v48, 32  ;;  %vm1942_vm10 = vcmp.lt.s32.totalorder %v1495_v48, 96 }
 0x113   : > { %590 = vrot.lane.b32.xlu1 %v1436_v35, %s1322_s11  ;;  %v426_v0 = vsel %vm424_vm1, 0.0, %v1328_v37  ;;  %v1613_v11 = vrot.slane %v425_v63, %v1405_v14 }
 0x114   : > { %592 = vrot.lane.b32.xlu0 %v1438_v36, %s1322_s11  ;;  %v1616_v12 = vrot.slane %v426_v0, %v1405_v14 }
 0x117   : > { %608 = vrot.lane.b32.xlu1 %v1436_v35, %s1323_s12 }
 0x118   : > { %610 = vrot.lane.b32.xlu0 %v1438_v36, %s1323_s12 }
 0x11b   : > { %327 = vrot.lane.b32.xlu1 %v1410_v17, %s1324_s13 }
 0x11c   : > { %329 = vrot.lane.b32.xlu0 %v1407_v16, %s1324_s13 }
 0x11f   : > { %352 = vrot.lane.b32.xlu1 %v1410_v17, %s1325_s14 }
 0x120   : > { %354 = vrot.lane.b32.xlu0 %v1407_v16, %s1325_s14 }
 0x123   : > { %334 = vrot.lane.b32.xlu1 %v1391_v9, %s1324_s13 }
 0x124   : > { %336 = vrot.lane.b32.xlu0 %v1389_v8, %s1324_s13 }
 0x127   : > { %427 = vrot.lane.b32.xlu1 %v1410_v17, %s1326_s15 }
 0x128   : > { %429 = vrot.lane.b32.xlu0 %v1407_v16, %s1326_s15 }
 0x12b   : > { %359 = vrot.lane.b32.xlu1 %v1391_v9, %s1325_s14 }
 0x12c   : > { %361 = vrot.lane.b32.xlu0 %v1389_v8, %s1325_s14 }
 0x12f   : > { %452 = vrot.lane.b32.xlu1 %v1410_v17, %s1327_s16 }
 0x130   : > { %454 = vrot.lane.b32.xlu0 %v1407_v16, %s1327_s16 }
 0x133   : > { %434 = vrot.lane.b32.xlu1 %v1391_v9, %s1326_s15 }
 0x134   : > { %436 = vrot.lane.b32.xlu0 %v1389_v8, %s1326_s15 }
 0x137   : > { %459 = vrot.lane.b32.xlu1 %v1391_v9, %s1327_s16 }
 0x138   : > { %461 = vrot.lane.b32.xlu0 %v1389_v8, %s1327_s16 }
 0x17d   : > { %v555_v32 = vpop.permute.xlu1 %554 }
 0x17e   : > { %v557_v34 = vpop.permute.xlu0 %556 }
 0x17f   : > { %v558_v42 = vsel %vm1948_vm14, %v555_v32, %v557_v34  ;;  %v559_v43 = vsel %vm1949_vm0, %v557_v34, %v555_v32 }
 0x180   : > { %v568_v55 = vadd.f32 %v1574_v45, %v559_v43  ;;  %v569_v56 = vadd.f32 %v1577_v46, %v558_v42 }
 0x181   : > { %v573_v44 = vpop.permute.xlu1 %572 }
 0x182   : > { %v575_v47 = vpop.permute.xlu0 %574  ;;  %v570_v4 = vmax.f32 %v1436_v35, %v568_v55  ;;  %v571_v5 = vmax.f32 %v1438_v36, %v569_v56 }
 0x183   : > { %v576_v51 = vsel %vm1950_vm3, %v573_v44, %v575_v47  ;;  %v577_v52 = vsel %vm1951_vm4, %v575_v47, %v573_v44 }
 0x184   : > { %v586_v60 = vadd.f32 %v1586_v53, %v576_v51  ;;  %v587_v61 = vadd.f32 %v1589_v54, %v577_v52 }
 0x185   : > { %v591_v57 = vpop.permute.xlu1 %590 }
 0x186   : > { %v593_v62 = vpop.permute.xlu0 %592  ;;  %v588_v13 = vmax.f32 %v570_v4, %v586_v60  ;;  %v589_v15 = vmax.f32 %v571_v5, %v587_v61 }
 0x187   : > { %v594_v2 = vsel %vm1939_vm5, %v591_v57, %v593_v62  ;;  %v595_v3 = vsel %vm1939_vm5, %v593_v62, %v591_v57 }
 0x188   : > { %v604_v6 = vadd.f32 %v1595_v58, %v595_v3  ;;  %v605_v7 = vadd.f32 %v1598_v59, %v594_v2 }
 0x189   : > { %v609_v10 = vpop.permute.xlu1 %608 }
 0x18a   : > { %v611_v18 = vpop.permute.xlu0 %610  ;;  %v606_v36 = vmax.f32 %v588_v13, %v604_v6  ;;  %v607_v20 = vmax.f32 %v589_v15, %v605_v7 }
 0x18b   : > { %v612_v19 = vsel %vm1938_vm6, %v609_v10, %v611_v18  ;;  %v613_v35 = vsel %vm1938_vm6, %v611_v18, %v609_v10 }
 0x18c   : > { %v622_v21 = vadd.f32 %v1613_v11, %v612_v19  ;;  %v623_v22 = vadd.f32 %v1616_v12, %v613_v35 }
 0x18d   : > { %v328_v26 = vpop.permute.xlu1 %327 }
 0x18e   : > { %v1624_v23 = vmax.f32 %v606_v36, %v622_v21  ;;  %v1626_v24 = vmax.f32 %v607_v20, %v623_v22  ;;  %v330_v25 = vpop.permute.xlu0 %329 }
 0x18f   : > { %v332_v38 = vsel %vm1941_vm7, %v328_v26, %v330_v25  ;;  %v333_v39 = vsel %vm1941_vm7, %v330_v25, %v328_v26 }
 0x190   : > { %628 = vrot.lane.b32.xlu0 %v1626_v24, %s1324_s13  ;;  %626 = vrot.lane.b32.xlu1 %v1624_v23, %s1324_s13  ;;  %v340_v41 = vsub.f32 %v333_v39, %v1410_v17  ;;  %v341_v42 = vsub.f32 %v332_v38, %v1407_v16 }
 0x191   : > { %v353_v28 = vpop.permute.xlu1 %352 }
 0x192   : > { %v355_v27 = vpop.permute.xlu0 %354  ;;  %v342_v55 = vand.u32 2147483647, %v340_v41  ;;  %v343_v56 = vand.u32 2147483647, %v341_v42 }
 0x193   : > { %v357_v40 = vsel %vm1940_vm9, %v353_v28, %v355_v27  ;;  %v358_v43 = vsel %vm1940_vm9, %v355_v27, %v353_v28 }
 0x194   : > { %646 = vrot.lane.b32.xlu0 %v1626_v24, %s1325_s14  ;;  %644 = vrot.lane.b32.xlu1 %v1624_v23, %s1325_s14  ;;  %v365_v44 = vsub.f32 %v357_v40, %v1410_v17  ;;  %v366_v51 = vsub.f32 %v358_v43, %v1407_v16  ;;  %vm344_vm11 = vcmp.eq.f32.partialorder %v342_v55, 1.0  ;;  %vm345_vm12 = vcmp.eq.f32.partialorder %v343_v56, 1.0 }
 0x195   : > { %v335_v30 = vpop.permute.xlu1 %334 }
 0x196   : > { %v337_v29 = vpop.permute.xlu0 %336  ;;  %v367_v57 = vand.u32 2147483647, %v365_v44  ;;  %v368_v2 = vand.u32 2147483647, %v366_v51 }
 0x197   : > { %v339_v60 = vsel %vm1941_vm7, %v337_v29, %v335_v30  ;;  %v338_v62 = vsel %vm1941_vm7, %v335_v30, %v337_v29 }
 0x198   : > { %664 = vrot.lane.b32.xlu0 %v1626_v24, %s1326_s15  ;;  %662 = vrot.lane.b32.xlu1 %v1624_v23, %s1326_s15  ;;  %vm346_vm13 = vcmp.eq.f32.partialorder %v339_v60, %v1391_v9  ;;  %vm369_vm15 = vcmp.eq.f32.partialorder %v367_v57, 1.0  ;;  %vm347_vm14 = vcmp.eq.f32.partialorder %v338_v62, %v1389_v8  ;;  %vm370_vm2 = vcmp.eq.f32.partialorder %v368_v2, 1.0 }
 0x199   : > { %v428_v32 = vpop.permute.xlu1 %427  ;;  %vm1685_vm3 = vmand %vm344_vm11, %vm346_vm13 }
 0x19a   : > { %v430_v31 = vpop.permute.xlu0 %429  ;;  %vm349_vm1 = vmand %vm345_vm12, %vm347_vm14  ;;  %v350_v28 = vsel %vm1685_vm3, 0.0, %v1328_v37  ;;  %vm1960_vm3 = vcmp.lt.s32.totalorder %v1495_v48, 96 }
 0x19b   : > { %v433_v50 = vsel %vm1943_vm8, %v430_v31, %v428_v32  ;;  %v432_v52 = vsel %vm1943_vm8, %v428_v32, %v430_v31  ;;  %v351_v29 = vsel %vm349_vm1, 0.0, %v1328_v37  ;;  %vm1961_vm1 = vmmov %vm1960_vm3 }
 0x19c   : > { %682 = vrot.lane.b32.xlu0 %v1626_v24, %s1327_s16  ;;  %680 = vrot.lane.b32.xlu1 %v1624_v23, %s1327_s16  ;;  %v440_v61 = vsub.f32 %v433_v50, %v1410_v17  ;;  %v441_v63 = vsub.f32 %v432_v52, %v1407_v16  ;;  %v1716_v38 = vrot.slane %v351_v29, %v1405_v14 }
 0x19d   : > { %v360_v34 = vpop.permute.xlu1 %359 }
 0x19e   : > { %v362_v33 = vpop.permute.xlu0 %361  ;;  %v442_v10 = vand.u32 2147483647, %v440_v61  ;;  %v443_v15 = vand.u32 2147483647, %v441_v63 }
 0x19f   : > { %v363_v3 = vsel %vm1940_vm9, %v360_v34, %v362_v33  ;;  %v364_v7 = vsel %vm1940_vm9, %v362_v33, %v360_v34  ;;  %v1713_v34 = vrot.slane %v350_v28, %v1405_v14 }
 0x1a0   : > { %vm371_vm0 = vcmp.eq.f32.partialorder %v363_v3, %v1391_v9  ;;  %vm372_vm4 = vcmp.eq.f32.partialorder %v364_v7, %v1389_v8  ;;  %vm444_vm6 = vcmp.eq.f32.partialorder %v442_v10, 2.0  ;;  %vm445_vm7 = vcmp.eq.f32.partialorder %v443_v15, 2.0 }
 0x1a1   : > { %v453_v49 = vpop.permute.xlu1 %452  ;;  %vm373_vm5 = vmand %vm369_vm15, %vm371_vm0 }
 0x1a2   : > { %v455_v47 = vpop.permute.xlu0 %454  ;;  %vm374_vm11 = vmand %vm370_vm2, %vm372_vm4  ;;  %v375_v30 = vsel %vm373_vm5, 0.0, %v1328_v37 }
 0x1a3   : > { %v457_v0 = vsel %vm1942_vm10, %v453_v49, %v455_v47  ;;  %v458_v4 = vsel %vm1942_vm10, %v455_v47, %v453_v49  ;;  %v376_v31 = vsel %vm374_vm11, 0.0, %v1328_v37  ;;  %v1725_v43 = vrot.slane %v375_v30, %v1405_v14 }
 0x1a4   : > { %v465_v13 = vsub.f32 %v457_v0, %v1410_v17  ;;  %v466_v18 = vsub.f32 %v458_v4, %v1407_v16  ;;  %v1728_v44 = vrot.slane %v376_v31, %v1405_v14  ;;  %vm1962_vm11 = vcmask 1041408  }
 0x1a5   : > { %v435_v6 = vpop.permute.xlu1 %434 }
 0x1a6   : > { %v437_v5 = vpop.permute.xlu0 %436  ;;  %v467_v16 = vand.u32 2147483647, %v465_v13  ;;  %v468_v21 = vand.u32 2147483647, %v466_v18 }
 0x1a7   : > { %v439_v19 = vsel %vm1943_vm8, %v437_v5, %v435_v6  ;;  %v438_v36 = vsel %vm1943_vm8, %v435_v6, %v437_v5 }
 0x1a8   : > { %vm446_vm9 = vcmp.eq.f32.partialorder %v439_v19, %v1391_v9  ;;  %vm447_vm13 = vcmp.eq.f32.partialorder %v438_v36, %v1389_v8  ;;  %vm469_vm15 = vcmp.eq.f32.partialorder %v467_v16, 2.0  ;;  %vm470_vm2 = vcmp.eq.f32.partialorder %v468_v21, 2.0 }
 0x1a9   : > { %v460_v17 = vpop.permute.xlu1 %459  ;;  %vm448_vm12 = vmand %vm444_vm6, %vm446_vm9  ;;  %vm1956_vm6 = vcmp.lt.s32.totalorder %v1495_v48, 112 }
 0x1aa   : > { %v462_v20 = vpop.permute.xlu0 %461  ;;  %vm449_vm14 = vmand %vm445_vm7, %vm447_vm13  ;;  %v450_v41 = vsel %vm448_vm12, 0.0, %v1328_v37  ;;  %vm1964_vm12 = vcmp.lt.s32.totalorder %v1495_v48, 1 }
 0x1ab   : > { %v463_v22 = vsel %vm1942_vm10, %v460_v17, %v462_v20  ;;  %v464_v25 = vsel %vm1942_vm10, %v462_v20, %v460_v17  ;;  %vm1954_vm10 = vcmp.lt.s32.totalorder %v1495_v48, 16  ;;  %vm1957_vm7 = vmmov %vm1956_vm6  ;;  %v1734_v50 = vrot.slane %v450_v41, %v1405_v14 }
 0x1ac   : > { %vm471_vm0 = vcmp.eq.f32.partialorder %v463_v22, %v1391_v9  ;;  %vm472_vm4 = vcmp.eq.f32.partialorder %v464_v25, %v1389_v8  ;;  %vm1955_vm8 = vmmov %vm1954_vm10  ;;  %v451_v9 = vsel %vm449_vm14, 0.0, %v1328_v37  ;;  %vm1966_vm14 = vcmp.lt.s32.totalorder %v1495_v48, 127 }
 0x1ad   : > { %vm473_vm5 = vmand %vm469_vm15, %vm471_vm0  ;;  %v1737_v51 = vrot.slane %v451_v9, %v1405_v14 }
 0x1ae   : > { %vm474_vm9 = vmand %vm470_vm2, %vm472_vm4  ;;  %v475_v60 = vsel %vm473_vm5, 0.0, %v1328_v37  ;;  %vm1968_vm2 = vcmp.lt.s32.totalorder %v1495_v48, 2  ;;  %vm1970_vm5 = vcmp.lt.s32.totalorder %v1495_v48, 126 }
 0x1af   : > { %v476_v61 = vsel %vm474_vm9, 0.0, %v1328_v37  ;;  %v1752_v5 = vrot.slane %v475_v60, %v1405_v14  ;;  %vm1963_vm13 = vmmov %vm1962_vm11  ;;  %vm1972_vm9 = vcmp.lt.s32.totalorder %v1495_v48, 16 }
 0x1b0   : > { %v1755_v6 = vrot.slane %v476_v61, %v1405_v14  ;;  %vm1965_vm15 = vmmov %vm1964_vm12 }
 0x1b1   : > { %vm1967_vm0 = vmmov %vm1966_vm14 }
 0x1b2   : > { %vm1969_vm4 = vmmov %vm1968_vm2 }
 0x202   : > { %v629_v26 = vpop.permute.xlu0 %628  ;;  %v627_v27 = vpop.permute.xlu1 %626 }
 0x203   : > { %v630_v32 = vsel %vm1954_vm10, %v627_v27, %v629_v26  ;;  %v631_v33 = vsel %vm1955_vm8, %v629_v26, %v627_v27  ;;  %vm1958_vm8 = vcmp.lt.s32.totalorder %v1495_v48, 32 }
 0x204   : > { %v640_v47 = vadd.f32 %v1713_v34, %v631_v33  ;;  %v641_v49 = vadd.f32 %v1716_v38, %v630_v32  ;;  %vm1959_vm10 = vmmov %vm1958_vm8 }
 0x206   : > { %v647_v39 = vpop.permute.xlu0 %646  ;;  %v645_v40 = vpop.permute.xlu1 %644  ;;  %v642_v0 = vmax.f32 %v1624_v23, %v640_v47  ;;  %v643_v2 = vmax.f32 %v1626_v24, %v641_v49 }
 0x207   : > { %v648_v8 = vsel %vm1956_vm6, %v645_v40, %v647_v39  ;;  %v649_v42 = vsel %vm1957_vm7, %v647_v39, %v645_v40  ;;  %vm1971_vm6 = vmmov %vm1970_vm5  ;;  %vm872_vm7 = vcmask 31744  }
 0x208   : > { %v658_v52 = vadd.f32 %v1725_v43, %v648_v8  ;;  %v659_v55 = vadd.f32 %v1728_v44, %v649_v42 }
 0x20a   : > { %v665_v56 = vpop.permute.xlu0 %664  ;;  %v663_v57 = vpop.permute.xlu1 %662  ;;  %v660_v37 = vmax.f32 %v642_v0, %v658_v52  ;;  %v661_v7 = vmax.f32 %v643_v2, %v659_v55 }
 0x20b   : > { %v666_v62 = vsel %vm1958_vm8, %v663_v57, %v665_v56  ;;  %v667_v63 = vsel %vm1959_vm10, %v665_v56, %v663_v57  ;;  %vm1973_vm8 = vmmov %vm1972_vm9  ;;  %vm1974_vm10 = vcmp.lt.s32.totalorder %v1495_v48, 112 }
 0x20c   : > { %v676_v3 = vadd.f32 %v1734_v50, %v667_v63  ;;  %v677_v4 = vadd.f32 %v1737_v51, %v666_v62 }
 0x20e   : > { %v683_v10 = vpop.permute.xlu0 %682  ;;  %v681_v13 = vpop.permute.xlu1 %680  ;;  %v678_v24 = vmax.f32 %v660_v37, %v676_v3  ;;  %v679_v18 = vmax.f32 %v661_v7, %v677_v4  ;;  %v1283_v7 = vld [vmem:[%s1931_s3] sm:$0xff]  }
 0x20f   : > { %v684_v15 = vsel %vm1960_vm3, %v681_v13, %v683_v10  ;;  %v685_v23 = vsel %vm1961_vm1, %v683_v10, %v681_v13  ;;  %1234 = vmatmul.mubr.msk.bf16.vlgmr.msra.gmra.mrb[0].mxu1 %vm872_vm7, %v1283_v7  ;;  %vm1975_vm3 = vmmov %vm1974_vm10  ;;  %vm1976_vm1 = vcmp.lt.s32.totalorder %v1495_v48, 32 }
 0x210   : > { %v694_v19 = vadd.f32 %v1752_v5, %v684_v15  ;;  %v695_v35 = vadd.f32 %v1755_v6, %v685_v23  ;;  %1034 = vmatprep.mubr.bf16.mxu1 %v1319_v1 }
 0x212   : > { %v696_v36 = vmax.f32 %v678_v24, %v694_v19  ;;  %v697_v20 = vmax.f32 %v679_v18, %v695_v35 }
 0x214   : > { %700 = vrot.lane.b32.xlu0 %v697_v20, %s1320_s7  ;;  %698 = vrot.lane.b32.xlu1 %v696_v36, %s1320_s7  ;;  %v866_v14 = vpack.c.bf16 %v697_v20, %v697_v20  ;;  %v865_v17 = vpack.c.bf16 %v696_v36, %v696_v36 }
 0x216   : > { %1230 = vmatprep.subr.msk.bf16.mxu0 %vm1962_vm11, %v866_v14  ;;  %v878_v16 = vsel %vm1963_vm13, %v865_v17, 0  ;;  %vm1977_vm11 = vmmov %vm1976_vm1  ;;  %vm1978_vm13 = vcmp.lt.s32.totalorder %v1495_v48, 96 }
 0x217   : > { %884 = vmatpush1.bf16.msra.mxu0 %v878_v16 }
 0x218   : > { %710 = vrot.lane.b32.xlu0 %v697_v20, %s1321_s10  ;;  %708 = vrot.lane.b32.xlu1 %v696_v36, %s1321_s10 }
 0x21c   : > { %720 = vrot.lane.b32.xlu0 %v697_v20, %s1322_s11  ;;  %718 = vrot.lane.b32.xlu1 %v696_v36, %s1322_s11 }
 0x220   : > { %730 = vrot.lane.b32.xlu0 %v697_v20, %s1323_s12  ;;  %728 = vrot.lane.b32.xlu1 %v696_v36, %s1323_s12 }
 0x286   : > { %v701_v21 = vpop.permute.xlu0 %700  ;;  %v699_v22 = vpop.permute.xlu1 %698 }
 0x287   : > { %v702_v25 = vsel %vm1964_vm12, %v699_v22, %v701_v21  ;;  %v703_v26 = vsel %vm1965_vm15, %v701_v21, %v699_v22  ;;  %vm1979_vm12 = vmmov %vm1978_vm13  ;;  %vm1980_vm15 = vcmask 1041408  }
 0x288   : > { %v704_v31 = vadd.f32 %v703_v26, %v1574_v45  ;;  %v705_v32 = vadd.f32 %v702_v25, %v1577_v46 }
 0x28a   : > { %v711_v27 = vpop.permute.xlu0 %710  ;;  %v709_v28 = vpop.permute.xlu1 %708  ;;  %v706_v42 = vmax.f32 %v696_v36, %v704_v31  ;;  %v707_v47 = vmax.f32 %v697_v20, %v705_v32 }
 0x28b   : > { %v712_v29 = vsel %vm1966_vm14, %v709_v28, %v711_v27  ;;  %v713_v30 = vsel %vm1967_vm0, %v711_v27, %v709_v28  ;;  %vm1981_vm14 = vmmov %vm1980_vm15  ;;  %vm1982_vm0 = vcmp.lt.s32.totalorder %v1495_v48, 1 }
 0x28c   : > { %v714_v33 = vadd.f32 %v712_v29, %v1586_v53  ;;  %v715_v39 = vadd.f32 %v713_v30, %v1589_v54 }
 0x28e   : > { %v721_v40 = vpop.permute.xlu0 %720  ;;  %v719_v41 = vpop.permute.xlu1 %718  ;;  %v716_v55 = vmax.f32 %v706_v42, %v714_v33  ;;  %v717_v56 = vmax.f32 %v707_v47, %v715_v39 }
 0x28f   : > { %v722_v9 = vsel %vm1968_vm2, %v719_v41, %v721_v40  ;;  %v723_v8 = vsel %vm1969_vm4, %v721_v40, %v719_v41  ;;  %vm1983_vm2 = vmmov %vm1982_vm0  ;;  %vm1984_vm4 = vcmp.lt.s32.totalorder %v1495_v48, 127 }
 0x290   : > { %v724_v49 = vadd.f32 %v723_v8, %v1595_v58  ;;  %v725_v52 = vadd.f32 %v722_v9, %v1598_v59 }
 0x292   : > { %v731_v57 = vpop.permute.xlu0 %730  ;;  %v729_v60 = vpop.permute.xlu1 %728  ;;  %v726_v63 = vmax.f32 %v716_v55, %v724_v49  ;;  %v727_v0 = vmax.f32 %v717_v56, %v725_v52 }
 0x293   : > { %v732_v61 = vsel %vm1970_vm5, %v729_v60, %v731_v57  ;;  %v733_v62 = vsel %vm1971_vm6, %v731_v57, %v729_v60  ;;  %vm1985_vm5 = vmmov %vm1984_vm4  ;;  %vm1986_vm6 = vcmp.lt.s32.totalorder %v1495_v48, 2 }
 0x294   : > { %v734_v2 = vadd.f32 %v732_v61, %v1613_v11  ;;  %v735_v3 = vadd.f32 %v733_v62, %v1616_v12 }
 0x296   : > { %v736_v4 = vmax.f32 %v726_v63, %v734_v2  ;;  %v737_v37 = vmax.f32 %v727_v0, %v735_v3 }
 0x298   : > { %740 = vrot.lane.b32.xlu0 %v737_v37, %s1324_s13  ;;  %738 = vrot.lane.b32.xlu1 %v736_v4, %s1324_s13 }
 0x29c   : > { %750 = vrot.lane.b32.xlu0 %v737_v37, %s1325_s14  ;;  %748 = vrot.lane.b32.xlu1 %v736_v4, %s1325_s14 }
 0x2a0   : > { %760 = vrot.lane.b32.xlu0 %v737_v37, %s1326_s15  ;;  %758 = vrot.lane.b32.xlu1 %v736_v4, %s1326_s15 }
 0x2a4   : > { %770 = vrot.lane.b32.xlu0 %v737_v37, %s1327_s16  ;;  %768 = vrot.lane.b32.xlu1 %v736_v4, %s1327_s16 }
 0x30a   : > { %v741_v10 = vpop.permute.xlu0 %740  ;;  %v739_v13 = vpop.permute.xlu1 %738 }
 0x30b   : > { %v742_v15 = vsel %vm1972_vm9, %v739_v13, %v741_v10  ;;  %v743_v23 = vsel %vm1973_vm8, %v741_v10, %v739_v13  ;;  %vm1987_vm9 = vmmov %vm1986_vm6  ;;  %vm1988_vm8 = vcmp.lt.s32.totalorder %v1495_v48, 126 }
 0x30c   : > { %v744_v36 = vadd.f32 %v743_v23, %v1713_v34  ;;  %v745_v20 = vadd.f32 %v742_v15, %v1716_v38 }
 0x30e   : > { %v751_v24 = vpop.permute.xlu0 %750  ;;  %v749_v18 = vpop.permute.xlu1 %748  ;;  %v746_v26 = vmax.f32 %v736_v4, %v744_v36  ;;  %v747_v27 = vmax.f32 %v737_v37, %v745_v20 }
 0x30f   : > { %v752_v19 = vsel %vm1974_vm10, %v749_v18, %v751_v24  ;;  %v753_v35 = vsel %vm1975_vm3, %v751_v24, %v749_v18  ;;  %vm1989_vm10 = vmmov %vm1988_vm8  ;;  %vm1990_vm3 = vcmp.lt.s32.totalorder %v1495_v48, 16 }
 0x310   : > { %v754_v14 = vadd.f32 %v752_v19, %v1725_v43  ;;  %v755_v17 = vadd.f32 %v753_v35, %v1728_v44 }
 0x312   : > { %v761_v16 = vpop.permute.xlu0 %760  ;;  %v759_v21 = vpop.permute.xlu1 %758  ;;  %v756_v30 = vmax.f32 %v746_v26, %v754_v14  ;;  %v757_v31 = vmax.f32 %v747_v27, %v755_v17 }
 0x313   : > { %v762_v22 = vsel %vm1976_vm1, %v759_v21, %v761_v16  ;;  %v763_v25 = vsel %vm1977_vm11, %v761_v16, %v759_v21  ;;  %vm1991_vm1 = vmmov %vm1990_vm3  ;;  %vm1992_vm11 = vcmp.lt.s32.totalorder %v1495_v48, 112 }
 0x314   : > { %v764_v28 = vadd.f32 %v763_v25, %v1734_v50  ;;  %v765_v29 = vadd.f32 %v762_v22, %v1737_v51 }
 0x316   : > { %v771_v32 = vpop.permute.xlu0 %770  ;;  %v769_v33 = vpop.permute.xlu1 %768  ;;  %v766_v41 = vmax.f32 %v756_v30, %v764_v28  ;;  %v767_v9 = vmax.f32 %v757_v31, %v765_v29 }
 0x317   : > { %v772_v39 = vsel %vm1978_vm13, %v769_v33, %v771_v32  ;;  %v773_v40 = vsel %vm1979_vm12, %v771_v32, %v769_v33  ;;  %vm1993_vm13 = vmmov %vm1992_vm11  ;;  %vm1994_vm12 = vcmp.lt.s32.totalorder %v1495_v48, 32 }
 0x318   : > { %v774_v8 = vadd.f32 %v772_v39, %v1752_v5  ;;  %v775_v42 = vadd.f32 %v773_v40, %v1755_v6 }
 0x31a   : > { %v776_v47 = vmax.f32 %v766_v41, %v774_v8  ;;  %v777_v49 = vmax.f32 %v767_v9, %v775_v42 }
 0x31c   : > { %780 = vrot.lane.b32.xlu0 %v777_v49, %s1320_s7  ;;  %778 = vrot.lane.b32.xlu1 %v776_v47, %s1320_s7  ;;  %v987_v52 = vpack.c.bf16 %v777_v49, %v777_v49  ;;  %v986_v55 = vpack.c.bf16 %v776_v47, %v776_v47  ;;  %s1248_s7 = sshll.u32 %s2001_s22, 5 }
 0x31e   : > { %1238 = vmatprep.subr.msk.bf16.mxu1 %vm1980_vm15, %v987_v52  ;;  %v997_v56 = vsel %vm1981_vm14, %v986_v55, 0  ;;  %vm1995_vm15 = vmmov %vm1994_vm12  ;;  %vm1996_vm14 = vcmp.lt.s32.totalorder %v1495_v48, 96 }
 0x31f   : > { %1003 = vmatpush1.bf16.msra.mxu1 %v997_v56 }
 0x320   : > { %790 = vrot.lane.b32.xlu0 %v777_v49, %s1321_s10  ;;  %788 = vrot.lane.b32.xlu1 %v776_v47, %s1321_s10  ;;  %s251_s10 = scalar_lea.vmem %s1934_s6, %s1248_s7 }
 0x324   : > { %800 = vrot.lane.b32.xlu0 %v777_v49, %s1322_s11  ;;  %798 = vrot.lane.b32.xlu1 %v776_v47, %s1322_s11 }
 0x328   : > { %810 = vrot.lane.b32.xlu0 %v777_v49, %s1323_s12  ;;  %808 = vrot.lane.b32.xlu1 %v776_v47, %s1323_s12 }
 0x38e   : > { %v781_v57 = vpop.permute.xlu0 %780  ;;  %v779_v60 = vpop.permute.xlu1 %778 }
 0x38f   : > { %v782_v61 = vsel %vm1982_vm0, %v779_v60, %v781_v57  ;;  %v783_v62 = vsel %vm1983_vm2, %v781_v57, %v779_v60  ;;  %vm1997_vm0 = vmmov %vm1996_vm14  ;;  %vm1998_vm2 = vcmask 1041408  }
 0x390   : > { %v784_v4 = vadd.f32 %v783_v62, %v1574_v45  ;;  %v785_v37 = vadd.f32 %v782_v61, %v1577_v46 }
 0x392   : > { %v791_v63 = vpop.permute.xlu0 %790  ;;  %v789_v0 = vpop.permute.xlu1 %788  ;;  %v786_v18 = vmax.f32 %v776_v47, %v784_v4  ;;  %v787_v19 = vmax.f32 %v777_v49, %v785_v37 }
 0x393   : > { %v792_v2 = vsel %vm1984_vm4, %v789_v0, %v791_v63  ;;  %v793_v3 = vsel %vm1985_vm5, %v791_v63, %v789_v0  ;;  %vm1999_vm4 = vmmov %vm1998_vm2 }
 0x394   : > { %v794_v7 = vadd.f32 %v792_v2, %v1586_v53  ;;  %v795_v10 = vadd.f32 %v793_v3, %v1589_v54 }
 0x396   : > { %v801_v13 = vpop.permute.xlu0 %800  ;;  %v799_v15 = vpop.permute.xlu1 %798  ;;  %v796_v36 = vmax.f32 %v786_v18, %v794_v7  ;;  %v797_v46 = vmax.f32 %v787_v19, %v795_v10  ;;  %v1286_v7 = vld [vmem:[%s1931_s3 + $0x18] sm:$0xff]  }
 0x397   : > { %v802_v23 = vsel %vm1986_vm6, %v799_v15, %v801_v13  ;;  %v803_v24 = vsel %vm1987_vm9, %v801_v13, %v799_v15 }
 0x398   : > { %v804_v35 = vadd.f32 %v803_v24, %v1595_v58  ;;  %v805_v45 = vadd.f32 %v802_v23, %v1598_v59  ;;  %v1284_v58 = vld [vmem:[%s1931_s3 + $0x10] sm:$0xff]  }
 0x399   : > { %1239 = vmatmul.mubr.msk.bf16.vlgmr.msra.gmra.mrb[0].mxu1 %vm872_vm7, %v1284_v58 }
 0x39a   : > { %v811_v20 = vpop.permute.xlu0 %810  ;;  %v809_v53 = vpop.permute.xlu1 %808  ;;  %v806_v17 = vmax.f32 %v796_v36, %v804_v35  ;;  %v807_v16 = vmax.f32 %v797_v46, %v805_v45  ;;  %1100 = vmatprep.mubr.bf16.mxu1 %v1319_v1  ;;  %v1116_v1 = vld [vmem:[%s1932_s4 + $0x8] sm:$0xff] }
 0x39b   : > { %v812_v54 = vsel %vm1988_vm8, %v809_v53, %v811_v20  ;;  %v813_v14 = vsel %vm1989_vm10, %v811_v20, %v809_v53 }
 0x39c   : > { %v814_v21 = vadd.f32 %v812_v54, %v1613_v11  ;;  %v815_v22 = vadd.f32 %v813_v14, %v1616_v12  ;;  %v1285_v11 = vld [vmem:[%s1931_s3 + $0x8] sm:$0xff]   ;;  %v1115_v12 = vld [vmem:[%s1932_s4] sm:$0xff] }
 0x39d   : > { %1231 = vmatmul.mubr.msk.bf16.vlgmr.msra.gmra.mrb[4].mxu0 %vm872_vm7, %v1285_v11 }
 0x39e   : > { %v816_v59 = vmax.f32 %v806_v17, %v814_v21  ;;  %v817_v25 = vmax.f32 %v807_v16, %v815_v22 }
 0x3a0   : > { %820 = vrot.lane.b32.xlu0 %v817_v25, %s1324_s13  ;;  %818 = vrot.lane.b32.xlu1 %v816_v59, %s1324_s13 }
 0x3a4   : > { %830 = vrot.lane.b32.xlu0 %v817_v25, %s1325_s14  ;;  %828 = vrot.lane.b32.xlu1 %v816_v59, %s1325_s14 }
 0x3a8   : > { %840 = vrot.lane.b32.xlu0 %v817_v25, %s1326_s15  ;;  %838 = vrot.lane.b32.xlu1 %v816_v59, %s1326_s15 }
 0x3ac   : > { %850 = vrot.lane.b32.xlu0 %v817_v25, %s1327_s16  ;;  %848 = vrot.lane.b32.xlu1 %v816_v59, %s1327_s16 }
 0x3b0   : > { %1124 = vperm.xlu0 %1279, %v1116_v1   ;;  %1119 = vperm.xlu1 %1280, %v1115_v12  }
 0x412   : > { %v821_v26 = vpop.permute.xlu0 %820  ;;  %v819_v27 = vpop.permute.xlu1 %818 }
 0x413   : > { %v822_v28 = vsel %vm1990_vm3, %v819_v27, %v821_v26  ;;  %v823_v29 = vsel %vm1991_vm1, %v821_v26, %v819_v27 }
 0x414   : > { %v824_v39 = vadd.f32 %v823_v29, %v1713_v34  ;;  %v825_v40 = vadd.f32 %v822_v28, %v1716_v38 }
 0x416   : > { %v831_v30 = vpop.permute.xlu0 %830  ;;  %v829_v31 = vpop.permute.xlu1 %828  ;;  %v826_v52 = vmax.f32 %v816_v59, %v824_v39  ;;  %v827_v55 = vmax.f32 %v817_v25, %v825_v40 }
 0x417   : > { %v832_v32 = vsel %vm1992_vm11, %v829_v31, %v831_v30  ;;  %v833_v33 = vsel %vm1993_vm13, %v831_v30, %v829_v31 }
 0x418   : > { %v834_v41 = vadd.f32 %v832_v32, %v1725_v43  ;;  %v835_v9 = vadd.f32 %v833_v33, %v1728_v44 }
 0x41a   : > { %v841_v8 = vpop.permute.xlu0 %840  ;;  %v839_v42 = vpop.permute.xlu1 %838  ;;  %v836_v57 = vmax.f32 %v826_v52, %v834_v41  ;;  %v837_v38 = vmax.f32 %v827_v55, %v835_v9 }
 0x41b   : > { %v842_v47 = vsel %vm1994_vm12, %v839_v42, %v841_v8  ;;  %v843_v49 = vsel %vm1995_vm15, %v841_v8, %v839_v42 }
 0x41c   : > { %v844_v56 = vadd.f32 %v843_v49, %v1734_v50  ;;  %v845_v34 = vadd.f32 %v842_v47, %v1737_v51 }
 0x41e   : > { %v851_v60 = vpop.permute.xlu0 %850  ;;  %v849_v43 = vpop.permute.xlu1 %848  ;;  %v846_v62 = vmax.f32 %v836_v57, %v844_v56  ;;  %v847_v63 = vmax.f32 %v837_v38, %v845_v34 }
 0x41f   : > { %v852_v44 = vsel %vm1996_vm14, %v849_v43, %v851_v60  ;;  %v853_v61 = vsel %vm1997_vm0, %v851_v60, %v849_v43 }
 0x420   : > { %v854_v0 = vadd.f32 %v852_v44, %v1752_v5  ;;  %v855_v2 = vadd.f32 %v853_v61, %v1755_v6 }
 0x422   : > { %v856_v3 = vmax.f32 %v846_v62, %v854_v0  ;;  %v857_v50 = vmax.f32 %v847_v63, %v855_v2 }
 0x424   : > { %v1052_v4 = vpack.c.bf16 %v856_v3, %v856_v3  ;;  %v1053_v51 = vpack.c.bf16 %v857_v50, %v857_v50 }
 0x426   : > { %1243 = vmatprep.subr.msk.bf16.mxu1 %vm1998_vm2, %v1053_v51  ;;  %v1063_v37 = vsel %vm1999_vm4, %v1052_v4, 0 }
 0x427   : > { %1069 = vmatpush1.bf16.msra.mxu1 %v1063_v37 }
 0x42a   : > { %1244 = vmatmul.mubr.msk.bf16.vlgmr.msra.gmra.mrb[0].mxu1 %vm872_vm7, %v1286_v7 }
 0x42f   : > { %v1120_v15 = vpop.permute.xlu1 %1119  ;;  %v1125_v46 = vpop.permute.xlu0 %1124 }
 0x470   : > { %v917_v48 = vpop.f32.mrb[4].mxu0 }
 0x471   : > { %v919_v10 = vpop.f32.mrb[5].mxu0 }
 0x472   : > { %v921_v5 = vpop.f32.mrb[6].mxu0 }
 0x473   : > { %v923_v13 = vpop.f32.mrb[7].mxu0 }
 0x4fd   : > { %v1102_v6 = vpop.f32.mrb[0].mxu1 }
 0x4fe   : > { %v1249_v23 = vadd.f32 %v1102_v6, %v917_v48  ;;  %v1104_v24 = vpop.f32.mrb[1].mxu1 }
 0x4ff   : > { %v1250_v18 = vadd.f32 %v1104_v24, %v919_v10  ;;  %v1106_v19 = vpop.f32.mrb[2].mxu1 }
 0x500   : > { %v1127_v35 = vadd.f32 %v1249_v23, %v1120_v15  ;;  %v1251_v45 = vadd.f32 %v1106_v19, %v921_v5  ;;  %v1108_v36 = vpop.f32.mrb[3].mxu1 }
 0x501   : > { %v1128_v20 = vadd.f32 %v1250_v18, %v1120_v15  ;;  %v1252_v53 = vadd.f32 %v1108_v36, %v923_v13 }
 0x502   : > { %v1131_v54 = vsub.f32 0.0, %v1127_v35  ;;  %v1129_v14 = vadd.f32 %v1251_v45, %v1125_v46 }
 0x503   : > { %v1132_v17 = vsub.f32 0.0, %v1128_v20  ;;  %v1130_v16 = vadd.f32 %v1252_v53, %v1125_v46 }
 0x504   : > { %v1135_v21 = vmul.f32 1.442695, %v1131_v54  ;;  %v1133_v22 = vsub.f32 0.0, %v1129_v14 }
 0x505   : > { %v1137_v58 = vmul.f32 1.442695, %v1132_v17  ;;  %v1134_v59 = vsub.f32 0.0, %v1130_v16 }
 0x506   : > { %1295 = vpow2.f32 %v1135_v21  ;;  %v1139_v25 = vmul.f32 1.442695, %v1133_v22 }
 0x507   : > { %1297 = vpow2.f32 %v1137_v58  ;;  %v1141_v11 = vmul.f32 1.442695, %v1134_v59 }
 0x508   : > { %1299 = vpow2.f32 %v1139_v25 }
 0x509   : > { %1301 = vpow2.f32 %v1141_v11 }
 0x510   : > { %v1296_v1 = vpop.eup %1295 }
 0x511   : > { %v1298_v12 = vpop.eup %1297  ;;  %v1143_v26 = vadd.f32 1.0, %v1296_v1 }
 0x512   : > { %v1300_v27 = vpop.eup %1299  ;;  %v1144_v28 = vadd.f32 1.0, %v1298_v12 }
 0x513   : > { %v1302_v29 = vpop.eup %1301  ;;  %1303 = vrcp.f32 %v1143_v26  ;;  %v1145_v30 = vadd.f32 1.0, %v1300_v27 }
 0x514   : > { %1305 = vrcp.f32 %v1144_v28  ;;  %v1146_v31 = vadd.f32 1.0, %v1302_v29 }
 0x515   : > { %1307 = vrcp.f32 %v1145_v30 }
 0x516   : > { %1309 = vrcp.f32 %v1146_v31 }
 0x51d   : > { %v1304_v32 = vpop.eup %1303 }
 0x51e   : > { %v1306_v33 = vpop.eup %1305  ;;  %v1151_v39 = vmul.f32 %v1304_v32, %v1127_v35 }
 0x51f   : > { %v1308_v40 = vpop.eup %1307  ;;  %v1152_v41 = vmul.f32 %v1306_v33, %v1128_v20 }
 0x520   : > { %v1310_v9 = vpop.eup %1309  ;;  %1155 = vst [vmem:[%s251_s10] sm:$0xff] %v1151_v39  ;;  %v1153_v8 = vmul.f32 %v1308_v40, %v1129_v14 }
 0x521   : > { %1156 = vst [vmem:[%s251_s10 + $0x8] sm:$0xff] %v1152_v41  ;;  %v1154_v42 = vmul.f32 %v1310_v9, %v1130_v16 }
 0x522   : > { %1157 = vst [vmem:[%s251_s10 + $0x10] sm:$0xff] %v1153_v8 }
 0x523   : > { %1158 = vst [vmem:[%s251_s10 + $0x18] sm:$0xff] %v1154_v42 }
 0x524 PF: > { %s16_s21 = sadd.s32 1, %s1317_s21  }
 0x525   : > { %p13_p4 = scmp.ge.s32.totalorder %s16_s21, 4  }
 0x527   :  { %15 = sbr.rel (!%p13_p4) target bundleno = 1 (0x1), region = 77 }

</bundles_post_ra>
